<compile_context>
chip_gen: v5e
topology: v5e:2x2
jax: 0.10.0
libtpu: 0.0.40
codegen_flags: <defaults>
</compile_context>

<pallas_src>
import math

import numpy as np

import jax
import jax.numpy as jnp
from jax.experimental import pallas as pl
from jax.experimental.pallas import tpu as pltpu


# ----------------------------------------------------------------------------
# Pallas kernels
# ----------------------------------------------------------------------------
def _s2d_conv_relu_kernel(x_ref, xh_ref, w_ref, b_ref, o_ref):
    """Fused stride-2 3x3 conv + bias + ReLU on a space-to-depth input tile.

    x_ref:  [1, tr, Wc, 4*Cin]  main coarse rows of the padded s2d input
    xh_ref: [1, 1,  Wc, 4*Cin]  halo coarse row (row index = tile_end)
    w_ref:  [16*Cin, Cout]      tap-fused weight packing (zero-padded taps)
    b_ref:  [1, Cout]           f32 bias
    o_ref:  [1, tr, Wo, Cout]   bf16/f32 channels-last output rows
    """
    tr, wc, c4 = x_ref.shape[1], x_ref.shape[2], x_ref.shape[3]
    wo = wc - 1
    cout = o_ref.shape[3]

    x_main = x_ref[0]                                   # [tr, Wc, 4Cin]
    x_halo = xh_ref[0]                                  # [1,  Wc, 4Cin]
    if tr > 1:
        x_dn = jnp.concatenate([x_main[1:], x_halo], axis=0)  # rows shifted +1
    else:
        x_dn = x_halo

    # 4 shifted (dh, dw) taps concatenated along the contraction axis ->
    # a single MXU dot with K = 16*Cin (instead of 4 shallow-K dots + adds).
    patch = jnp.concatenate(
        [x_main[:, 0:wo, :], x_main[:, 1:wo + 1, :],
         x_dn[:, 0:wo, :], x_dn[:, 1:wo + 1, :]], axis=-1)     # [tr, Wo, 16Cin]
    patch = patch.reshape(tr * wo, 4 * c4)
    acc = jnp.dot(patch, w_ref[...], preferred_element_type=jnp.float32)
    acc = jnp.maximum(acc + b_ref[...], 0.0)            # bias/ReLU stay f32
    o_ref[0] = acc.reshape(tr, wo, cout).astype(o_ref.dtype)


def _dec_head_kernel(f_ref, wd_ref, bd_ref, wht_ref, bh_ref, o_ref):
    """Fused decoder 1x1 conv + ReLU + classification-head 1x1 conv.

    f_ref: [tm, C2] bf16 rows, wd: [C2, Cd] bf16, wht: [nc, Cd] bf16,
    bd: [1, Cd] f32, bh: [nc, 1] f32, o_ref: [nc, tm] f32 class-major logits
    (lane-dense store; no downstream transpose needed).
    """
    d = jnp.dot(f_ref[...], wd_ref[...], preferred_element_type=jnp.float32)
    d = jnp.maximum(d + bd_ref[...], 0.0)
    # second (tiny) dot contracts both last dims -> [nc, tm] class-major
    lg = jax.lax.dot_general(wht_ref[...], d.astype(wht_ref.dtype),
                             (((1,), (1,)), ((), ())),
                             preferred_element_type=jnp.float32)
    o_ref[...] = (lg + bh_ref[...]).astype(o_ref.dtype)


def _make_upsample_softmax_kernel(num_class, scales):
    """Per-image fused 2x bilinear (align_corners) upsample of class-major
    logits + temperature softmax + soft depth expectation."""
    scales = tuple(float(s) for s in np.asarray(scales).reshape(-1))
    assert len(scales) == num_class

    def kernel(inv_t_ref, lg_ref, uh_ref, uwt_ref, o_ref):
        # lg_ref: [nc, 1, H2, W2] f32, uh: [Hhi, H2], uwt: [W2, Whi]
        # o_ref:  [1, Hhi, Whi] f32 depth
        inv_t = inv_t_ref[0, 0]
        uh = uh_ref[...]
        uwt = uwt_ref[...]
        ups = []
        for c in range(num_class):
            row = lg_ref[c, 0]                                  # [H2, W2]
            t = jnp.dot(row, uwt, preferred_element_type=jnp.float32)
            up = jnp.dot(uh, t, preferred_element_type=jnp.float32)
            ups.append(up * inv_t)                              # logits / T
        m = ups[0]
        for c in range(1, num_class):
            m = jnp.maximum(m, ups[c])
        den = jnp.zeros_like(m)
        num = jnp.zeros_like(m)
        for c in range(num_class):
            e = jnp.exp(ups[c] - m)
            den = den + e
            num = num + e * scales[c]                 # bin centers: immediates
        # normalization reciprocal rides the (otherwise idle) EUP slot
        o_ref[0] = (num * pl.reciprocal(den, approx=True)).astype(o_ref.dtype)

    return kernel


# ----------------------------------------------------------------------------
# pallas_call wrappers (grids / BlockSpecs)
# ----------------------------------------------------------------------------
def _largest_divisor_leq(n, target):
    t = max(1, min(n, int(target)))
    while n % t:
        t -= 1
    return t


def s2d_conv_relu(xs, w_fused, bias, row_tile=64, out_dtype=jnp.bfloat16):
    """xs: [B, Ho+1, Wo+1, 4*Cin] -> [B, Ho, Wo, Cout].

    Row-tiled with a 1-coarse-row halo (second BlockSpec on the same array),
    grid = (B, Ho/tr), both axes 'parallel' so v7x can use both TensorCores.
    """
    B, Hc, Wc, C4 = xs.shape
    K, Cout = w_fused.shape
    Ho, Wo = Hc - 1, Wc - 1
    tr = _largest_divisor_leq(Ho, row_tile)   # halve row_tile on v7x (64 MiB VMEM/TC)
    grid = (B, Ho // tr)
    return pl.pallas_call(
        _s2d_conv_relu_kernel,
        out_shape=jax.ShapeDtypeStruct((B, Ho, Wo, Cout), out_dtype),
        grid=grid,
        in_specs=[
            pl.BlockSpec((1, tr, Wc, C4), lambda b, i: (b, i, 0, 0)),
            # halo: single coarse row at tile_end (block size 1 -> element idx)
            pl.BlockSpec((1, 1, Wc, C4), lambda b, i: (b, (i + 1) * tr, 0, 0)),
            pl.BlockSpec((K, Cout), lambda b, i: (0, 0)),
            pl.BlockSpec((1, Cout), lambda b, i: (0, 0)),
        ],
        out_specs=pl.BlockSpec((1, tr, Wo, Cout), lambda b, i: (b, i, 0, 0)),
        compiler_params=pltpu.CompilerParams(
            dimension_semantics=("parallel", "parallel"),
            vmem_limit_bytes=64 * 1024 * 1024),
    )(xs, xs, w_fused, bias.reshape(1, Cout))
    # TODO(synk): for very wide images additionally tile the width dimension.


def dec_head(f_rows, wd, bd, wht, bh_col, tm=8192):
    """Row-tiled fused decoder+head: [M, C2] bf16 -> [nc, M] f32 class-major
    logits (lane-dense output)."""
    M, C2 = f_rows.shape
    Cd = wd.shape[1]
    nc = wht.shape[0]
    tm = min(tm, M)
    if tm < M:
        tm = max(128, (tm // 128) * 128)   # keep lane/sublane-aligned tiles
    return pl.pallas_call(
        _dec_head_kernel,
        out_shape=jax.ShapeDtypeStruct((nc, M), jnp.float32),
        grid=(pl.cdiv(M, tm),),
        in_specs=[
            pl.BlockSpec((tm, C2), lambda i: (i, 0)),
            pl.BlockSpec((C2, Cd), lambda i: (0, 0)),
            pl.BlockSpec((1, Cd), lambda i: (0, 0)),
            pl.BlockSpec((nc, Cd), lambda i: (0, 0)),
            pl.BlockSpec((nc, 1), lambda i: (0, 0)),
        ],
        out_specs=pl.BlockSpec((nc, tm), lambda i: (0, i)),
        compiler_params=pltpu.CompilerParams(
            dimension_semantics=("parallel",),
            vmem_limit_bytes=32 * 1024 * 1024),
    )(f_rows, wd, bd.reshape(1, Cd), wht, bh_col)


def upsample_softmax_expect(lg_cm, uh, uwt, scales, inv_temperature):
    """Per-image fused upsample + softmax + expectation.

    lg_cm: [nc, B, H2, W2] f32 class-major low-res logits
    uh:    [Hhi, H2], uwt: [W2, Whi] fixed interpolation matrices
    -> depth [B, Hhi, Whi] f32
    """
    nc, B, H2, W2 = lg_cm.shape
    Hhi, Whi = uh.shape[0], uwt.shape[1]
    inv_t = jnp.full((1, 1), inv_temperature, jnp.float32)
    kernel = _make_upsample_softmax_kernel(nc, scales)
    return pl.pallas_call(
        kernel,
        out_shape=jax.ShapeDtypeStruct((B, Hhi, Whi), jnp.float32),
        grid=(B,),
        in_specs=[
            pl.BlockSpec(memory_space=pltpu.MemorySpace.SMEM),   # 1/T scalar
            pl.BlockSpec((nc, 1, H2, W2), lambda b: (0, b, 0, 0)),
            pl.BlockSpec((Hhi, H2), lambda b: (0, 0)),
            pl.BlockSpec((W2, Whi), lambda b: (0, 0)),
        ],
        out_specs=pl.BlockSpec((1, Hhi, Whi), lambda b: (b, 0, 0)),
        compiler_params=pltpu.CompilerParams(
            dimension_semantics=("parallel",),
            vmem_limit_bytes=32 * 1024 * 1024),
    )(inv_t, lg_cm, uh, uwt)


# ----------------------------------------------------------------------------
# Plain-JAX glue (layout plumbing only)
# ----------------------------------------------------------------------------
def _pad_s2d(x_nhwc):
    """Zero-pad by 1 and fold 2x2 phases into channels (bf16 single pass).

    [B, H, W, C] -> [B, H//2+1, W//2+1, 4*C], channel index = (ph*2+pw)*C + c.
    TODO(synk): fuse this pad/space-to-depth into the conv kernel's input DMA
    (or have conv1 write f1 directly in conv2's s2d layout) to save one HBM
    pass of the activation per stage.
    """
    B, H, W, C = x_nhwc.shape
    assert H % 2 == 0 and W % 2 == 0
    xp = jnp.pad(x_nhwc, ((0, 0), (1, 1), (1, 1), (0, 0)))
    Hc, Wc = H // 2 + 1, W // 2 + 1
    xs = xp.reshape(B, Hc, 2, Wc, 2, C).transpose(0, 1, 3, 2, 4, 5)
    return xs.reshape(B, Hc, Wc, 4 * C)


def _pack_s2d_weights(w_hwio):
    """[3,3,Cin,Cout] conv weight -> [16*Cin, Cout] tap-fused packing.

    Row index = ((dh*2+dw)*4 + (ph*2+pw))*Cin + c; taps with 2*dh+ph > 2 or
    2*dw+pw > 2 fall outside the 3x3 kernel and are zero.
    """
    K, _, Cin, Cout = w_hwio.shape
    assert K == 3
    packed = jnp.zeros((2, 2, 2, 2, Cin, Cout), w_hwio.dtype)
    for dh in range(2):
        for dw in range(2):
            for ph in range(2):
                for pw in range(2):
                    kh, kw = 2 * dh + ph, 2 * dw + pw
                    if kh < 3 and kw < 3:
                        packed = packed.at[dh, dw, ph, pw].set(w_hwio[kh, kw])
    return packed.reshape(16 * Cin, Cout)


def _bilinear_matrix_align_corners(in_size, out_size):
    """1-D bilinear interpolation matrix U[out, in], align_corners=True."""
    if in_size == 1:
        return jnp.ones((out_size, 1), jnp.float32)
    s = jnp.arange(out_size, dtype=jnp.float32) * (in_size - 1) / (out_size - 1)
    i0 = jnp.clip(jnp.floor(s).astype(jnp.int32), 0, in_size - 2)
    w = s - i0.astype(jnp.float32)
    rows = jnp.arange(out_size)
    U = jnp.zeros((out_size, in_size), jnp.float32)
    U = U.at[rows, i0].add(1.0 - w)
    U = U.at[rows, i0 + 1].add(w)
    return U


def get_class_scales(reg_mode, num_class, depth_range):
    """Faithful port of DepthEstimationModule.get_class_scales (host-side)."""
    min_depth, max_depth = depth_range
    if "log" in reg_mode:
        scales = np.exp(np.linspace(math.log(min_depth), math.log(max_depth),
                                    num_class + 1))
    elif "lin" in reg_mode:
        scales = np.linspace(min_depth, max_depth, num_class + 1)
    else:
        raise ValueError(reg_mode)
    return ((scales[1:] + scales[:-1]) / 2.0).astype(np.float32)


# ----------------------------------------------------------------------------
# Model
# ----------------------------------------------------------------------------
class DepthEstimationModulePallas:
    def __init__(self, in_ch=4, enc1=16, enc2=32, dec_feat=32, num_class=8,
                 depth_range=(1.0, 10.0), reg_mode="log_cls", hard_pred=False,
                 row_tile=64, dec_tm=8192):
        assert not hard_pred  # soft expectation over bins
        self.num_class = num_class
        self.row_tile = row_tile   # conv row-tile target; halve on v7x
        self.dec_tm = dec_tm
        key = jax.random.PRNGKey(0)
        k1, k2, k3, k4 = jax.random.split(key, 4)

        def kaiming(k, shape, fan_in):
            return jax.random.normal(k, shape, jnp.float32) * math.sqrt(
                2.0 / fan_in)

        # encoder (ResNetEncoder stand-in): two 3x3 stride-2 conv + ReLU stages
        self.w1_hwio = kaiming(k1, (3, 3, in_ch, enc1), 9 * in_ch).astype(
            jnp.bfloat16)
        self.b1 = jnp.zeros((enc1,), jnp.float32)
        self.w2_hwio = kaiming(k2, (3, 3, enc1, enc2), 9 * enc1).astype(
            jnp.bfloat16)
        self.b2 = jnp.zeros((enc2,), jnp.float32)
        self.w1_fused = _pack_s2d_weights(self.w1_hwio)   # [16*in_ch, enc1]
        self.w2_fused = _pack_s2d_weights(self.w2_hwio)   # [16*enc1, enc2]
        # decoder (SimpleDecoder stand-in): 1x1 conv + ReLU (+ 2x bilinear)
        self.wd = kaiming(k3, (enc2, dec_feat), enc2).astype(jnp.bfloat16)
        self.bd = jnp.zeros((dec_feat,), jnp.float32)
        # classification head ('log_cls'): 1x1 conv to num_class logits
        self.wh = kaiming(k4, (dec_feat, num_class), dec_feat).astype(
            jnp.bfloat16)
        self.wht = self.wh.T                               # [nc, dec_feat]
        self.bh = jnp.zeros((num_class,), jnp.float32)
        self.bh_col = self.bh.reshape(num_class, 1)
        # depth-bin centers (registered buffer 'scales')
        self.scales_np = get_class_scales(reg_mode, num_class, depth_range)
        self.scales = jnp.asarray(self.scales_np, jnp.float32)

    def __call__(self, x_nchw, temperature=1.0):
        B, _, H, W = x_nchw.shape
        assert H % 4 == 0 and W % 4 == 0
        nc = self.num_class
        # single layout change at the API boundary; channels-last bf16 onwards
        x = x_nchw.transpose(0, 2, 3, 1).astype(jnp.bfloat16)

        # ---- encoder: fused tap-concatenated s2d conv kernels (row-tiled) --
        xs1 = _pad_s2d(x)                                    # bf16
        f1 = s2d_conv_relu(xs1, self.w1_fused, self.b1,
                           row_tile=self.row_tile,
                           out_dtype=jnp.bfloat16)           # [B,H1,W1,enc1]
        xs2 = _pad_s2d(f1)                                   # bf16
        f2 = s2d_conv_relu(xs2, self.w2_fused, self.b2,
                           row_tile=self.row_tile,
                           out_dtype=jnp.bfloat16)           # [B,H2,W2,enc2]
        B_, H2, W2, C2 = f2.shape

        # ---- fused decoder 1x1 + ReLU + head 1x1 -> class-major logits -----
        lg = dec_head(f2.reshape(B * H2 * W2, C2), self.wd, self.bd,
                      self.wht, self.bh_col, tm=self.dec_tm)   # [nc, M2]
        lg = lg.reshape(nc, B, H2, W2)                         # free reshape

        # ---- 2x bilinear (align_corners=True) upsample, commuted past the
        #      linear head and fused with softmax + depth expectation --------
        # ---- self.upsample == nn.Identity for enc_mode='resnet' ------------
        Ho, Wo = 2 * H2, 2 * W2
        Uh = _bilinear_matrix_align_corners(H2, Ho)            # [Ho, H2]
        UwT = _bilinear_matrix_align_corners(W2, Wo).T         # [W2, Wo]
        depth = upsample_softmax_expect(lg, Uh, UwT, self.scales_np,
                                        1.0 / temperature)     # [B, Ho, Wo]
        return depth[:, None, :, :]                            # NCHW [B,1,Ho,Wo]


# ----------------------------------------------------------------------------
# Plain-JAX/XLA reference (original op order) for a correctness cross-check
# ----------------------------------------------------------------------------
def reference_forward(model, x_nchw, temperature=1.0):
    x = x_nchw.transpose(0, 2, 3, 1).astype(jnp.float32)

    def conv_s2_relu(inp, w_hwio, b):
        y = jax.lax.conv_general_dilated(
            inp, w_hwio.astype(jnp.float32), window_strides=(2, 2),
            padding=((1, 1), (1, 1)),
            dimension_numbers=("NHWC", "HWIO", "NHWC"))
        return jnp.maximum(y + b, 0.0)

    f1 = conv_s2_relu(x, model.w1_hwio, model.b1)
    f2 = conv_s2_relu(f1, model.w2_hwio, model.b2)
    d = jnp.maximum(jnp.einsum("bhwc,cd->bhwd", f2,
                               model.wd.astype(jnp.float32)) + model.bd, 0.0)
    B, H2, W2, _ = d.shape
    Uh = _bilinear_matrix_align_corners(H2, 2 * H2)
    Uw = _bilinear_matrix_align_corners(W2, 2 * W2)
    d_up = jnp.einsum("bhwc,yh,xw->byxc", d, Uh, Uw)
    logits = (jnp.einsum("byxc,cn->byxn", d_up,
                         model.wh.astype(jnp.float32)) + model.bh) / temperature
    p = jax.nn.softmax(logits, axis=-1)
    depth = jnp.sum(p * model.scales, axis=-1)
    return depth[:, None, :, :]


# ----------------------------------------------------------------------------
if __name__ == "__main__":
    key = jax.random.PRNGKey(0)
    x = jax.random.normal(key, (2, 4, 32, 32), jnp.float32)  # NCHW

    # row_tile=8 so the stage-1 conv grid has 2 row tiles per image and the
    # halo path across tile boundaries is exercised at this small test size.
    model = DepthEstimationModulePallas(in_ch=4, dec_feat=32, num_class=8,
                                        depth_range=(1.0, 10.0), row_tile=8)
    fwd = jax.jit(lambda inp: model(inp, temperature=1.0))
    out = jax.block_until_ready(fwd(x))

    assert out.shape == (2, 1, 16, 16), out.shape
    assert bool(jnp.all(jnp.isfinite(out)))
    # soft depth must lie inside the depth-bin-center range
    assert bool(jnp.all(out >= model.scales[0] - 5e-2))
    assert bool(jnp.all(out <= model.scales[-1] + 5e-2))
    # cross-check against the plain-JAX reference (original op order);
    # tolerance covers bf16 activations/matmuls + approx reciprocal
    ref = reference_forward(model, x, temperature=1.0)
    max_err = float(jnp.max(jnp.abs(out - ref)))
    assert max_err < 0.05 * (10.0 - 1.0), f"max |pallas - ref| = {max_err}"
    print("KERNEL_OK")
</pallas_src>

<mosaic_0001>
module attributes {stable_mosaic.version = 11 : i64} {
  func.func @_s2d_conv_relu_kernel(%arg0: i32, %arg1: i32, %arg2: memref<1x8x17x16xbf16, #tpu.memory_space<vmem>>, %arg3: memref<1x1x17x16xbf16, #tpu.memory_space<vmem>>, %arg4: memref<64x16xbf16, #tpu.memory_space<vmem>>, %arg5: memref<1x16xf32, #tpu.memory_space<vmem>>, %arg6: memref<1x8x16x16xbf16, #tpu.memory_space<vmem>>) attributes {dimension_semantics = [#tpu.dimension_semantics<parallel>, #tpu.dimension_semantics<parallel>], iteration_bounds = array<i64: 2, 2>, scalar_prefetch = 0 : i64, scratch_operands = 0 : i64, tpu.core_type = #tpu.core_type<tc>, window_params = [{transform_indices = @transform_0, window_bounds = array<i64: 1, 8, 17, 16>}, {transform_indices = @transform_1, window_bounds = array<i64: 1, 1, 17, 16>}, {pipeline_mode = #tpu.pipeline_mode<synchronous>, transform_indices = @transform_2, window_bounds = array<i64: 64, 16>}, {pipeline_mode = #tpu.pipeline_mode<synchronous>, transform_indices = @transform_3, window_bounds = array<i64: 1, 16>}, {transform_indices = @transform_4, window_bounds = array<i64: 1, 8, 16, 16>}]} {
    %c0 = arith.constant 0 : index
    %c0_0 = arith.constant 0 : index
    %c0_1 = arith.constant 0 : index
    %c0_2 = arith.constant 0 : index
    %0 = vector.load %arg2[%c0, %c0_0, %c0_1, %c0_2] : memref<1x8x17x16xbf16, #tpu.memory_space<vmem>>, vector<1x8x17x16xbf16>
    %1 = vector.shape_cast %0 : vector<1x8x17x16xbf16> to vector<8x17x16xbf16>
    %c0_3 = arith.constant 0 : index
    %c0_4 = arith.constant 0 : index
    %c0_5 = arith.constant 0 : index
    %c0_6 = arith.constant 0 : index
    %2 = vector.load %arg3[%c0_3, %c0_4, %c0_5, %c0_6] : memref<1x1x17x16xbf16, #tpu.memory_space<vmem>>, vector<1x1x17x16xbf16>
    %3 = vector.shape_cast %2 : vector<1x1x17x16xbf16> to vector<1x17x16xbf16>
    %4 = vector.extract_strided_slice %1 {offsets = [1, 0, 0], sizes = [7, 17, 16], strides = [1, 1, 1]} : vector<8x17x16xbf16> to vector<7x17x16xbf16>
    %5 = tpu.concatenate %4, %3 in 0 : vector<7x17x16xbf16>, vector<1x17x16xbf16> -> vector<8x17x16xbf16>
    %6 = vector.extract_strided_slice %1 {offsets = [0, 0, 0], sizes = [8, 16, 16], strides = [1, 1, 1]} : vector<8x17x16xbf16> to vector<8x16x16xbf16>
    %7 = vector.extract_strided_slice %1 {offsets = [0, 1, 0], sizes = [8, 16, 16], strides = [1, 1, 1]} : vector<8x17x16xbf16> to vector<8x16x16xbf16>
    %8 = vector.extract_strided_slice %5 {offsets = [0, 0, 0], sizes = [8, 16, 16], strides = [1, 1, 1]} : vector<8x17x16xbf16> to vector<8x16x16xbf16>
    %9 = vector.extract_strided_slice %5 {offsets = [0, 1, 0], sizes = [8, 16, 16], strides = [1, 1, 1]} : vector<8x17x16xbf16> to vector<8x16x16xbf16>
    %10 = tpu.concatenate %6, %7, %8, %9 in 2 : vector<8x16x16xbf16>, vector<8x16x16xbf16>, vector<8x16x16xbf16>, vector<8x16x16xbf16> -> vector<8x16x64xbf16>
    %11 = vector.shape_cast %10 : vector<8x16x64xbf16> to vector<128x64xbf16>
    %c0_7 = arith.constant 0 : index
    %c0_8 = arith.constant 0 : index
    %12 = vector.load %arg4[%c0_7, %c0_8] : memref<64x16xbf16, #tpu.memory_space<vmem>>, vector<64x16xbf16>
    %cst = arith.constant dense<0.000000e+00> : vector<128x16xf32>
    %13 = tpu.matmul %11, %12, %cst {dimension_numbers = #tpu.dot_dimension_numbers<[1], [0], [0], [1], [0, 0, 1, 1], [], []>} : vector<128x64xbf16>, vector<64x16xbf16>, vector<128x16xf32> -> vector<128x16xf32>
    %c0_9 = arith.constant 0 : index
    %c0_10 = arith.constant 0 : index
    %14 = vector.load %arg5[%c0_9, %c0_10] : memref<1x16xf32, #tpu.memory_space<vmem>>, vector<1x16xf32>
    %15 = vector.broadcast %14 : vector<1x16xf32> to vector<128x16xf32>
    %16 = arith.addf %13, %15 : vector<128x16xf32>
    %cst_11 = arith.constant 0.000000e+00 : f32
    %17 = vector.broadcast %cst_11 : f32 to vector<128x16xf32>
    %18 = arith.maximumf %16, %17 : vector<128x16xf32>
    %19 = vector.shape_cast %18 : vector<128x16xf32> to vector<8x16x16xf32>
    %20 = arith.truncf %19 : vector<8x16x16xf32> to vector<8x16x16xbf16>
    %c0_12 = arith.constant 0 : index
    %c0_13 = arith.constant 0 : index
    %c0_14 = arith.constant 0 : index
    %c0_15 = arith.constant 0 : index
    %21 = vector.load %arg6[%c0_12, %c0_13, %c0_14, %c0_15] : memref<1x8x16x16xbf16, #tpu.memory_space<vmem>>, vector<1x8x16x16xbf16>
    %22 = vector.shape_cast %21 : vector<1x8x16x16xbf16> to vector<8x16x16xbf16>
    %23 = vector.shape_cast %20 : vector<8x16x16xbf16> to vector<1x8x16x16xbf16>
    tpu.vector_store %arg6[%c0_12, %c0_13, %c0_14, %c0_15], %23 {strides = array<i32>} : memref<1x8x16x16xbf16, #tpu.memory_space<vmem>>, vector<1x8x16x16xbf16>,
    return
  }
  func.func @transform_0(%arg0: i32, %arg1: i32) -> (i32, i32, i32, i32) {
    %c0_i32 = arith.constant 0 : i32
    %c0_i32_0 = arith.constant 0 : i32
    %c0_i32_1 = arith.constant 0 : i32
    return %arg0, %arg1, %c0_i32, %c0_i32_0 : i32, i32, i32, i32
  }
  func.func @transform_1(%arg0: i32, %arg1: i32) -> (i32, i32, i32, i32) {
    %c1_i32 = arith.constant 1 : i32
    %0 = arith.addi %arg1, %c1_i32 : i32
    %c8_i32 = arith.constant 8 : i32
    %1 = arith.muli %0, %c8_i32 : i32
    %c0_i32 = arith.constant 0 : i32
    %c0_i32_0 = arith.constant 0 : i32
    %c0_i32_1 = arith.constant 0 : i32
    return %arg0, %1, %c0_i32, %c0_i32_0 : i32, i32, i32, i32
  }
  func.func @transform_2(%arg0: i32, %arg1: i32) -> (i32, i32) {
    %c0_i32 = arith.constant 0 : i32
    %c0_i32_0 = arith.constant 0 : i32
    %c0_i32_1 = arith.constant 0 : i32
    return %c0_i32, %c0_i32_0 : i32, i32
  }
  func.func @transform_3(%arg0: i32, %arg1: i32) -> (i32, i32) {
    %c0_i32 = arith.constant 0 : i32
    %c0_i32_0 = arith.constant 0 : i32
    %c0_i32_1 = arith.constant 0 : i32
    return %c0_i32, %c0_i32_0 : i32, i32
  }
  func.func @transform_4(%arg0: i32, %arg1: i32) -> (i32, i32, i32, i32) {
    %c0_i32 = arith.constant 0 : i32
    %c0_i32_0 = arith.constant 0 : i32
    %c0_i32_1 = arith.constant 0 : i32
    return %arg0, %arg1, %c0_i32, %c0_i32_0 : i32, i32, i32, i32
  }
}

module attributes {stable_mosaic.version = 11 : i64} {
  func.func @_s2d_conv_relu_kernel(%arg0: i32, %arg1: i32, %arg2: memref<1x8x9x64xbf16, #tpu.memory_space<vmem>>, %arg3: memref<1x1x9x64xbf16, #tpu.memory_space<vmem>>, %arg4: memref<256x32xbf16, #tpu.memory_space<vmem>>, %arg5: memref<1x32xf32, #tpu.memory_space<vmem>>, %arg6: memref<1x8x8x32xbf16, #tpu.memory_space<vmem>>) attributes {dimension_semantics = [#tpu.dimension_semantics<parallel>, #tpu.dimension_semantics<parallel>], iteration_bounds = array<i64: 2, 1>, scalar_prefetch = 0 : i64, scratch_operands = 0 : i64, tpu.core_type = #tpu.core_type<tc>, window_params = [{transform_indices = @transform_0, window_bounds = array<i64: 1, 8, 9, 64>}, {transform_indices = @transform_1, window_bounds = array<i64: 1, 1, 9, 64>}, {pipeline_mode = #tpu.pipeline_mode<synchronous>, transform_indices = @transform_2, window_bounds = array<i64: 256, 32>}, {pipeline_mode = #tpu.pipeline_mode<synchronous>, transform_indices = @transform_3, window_bounds = array<i64: 1, 32>}, {transform_indices = @transform_4, window_bounds = array<i64: 1, 8, 8, 32>}]} {
    %c0 = arith.constant 0 : index
    %c0_0 = arith.constant 0 : index
    %c0_1 = arith.constant 0 : index
    %c0_2 = arith.constant 0 : index
    %0 = vector.load %arg2[%c0, %c0_0, %c0_1, %c0_2] : memref<1x8x9x64xbf16, #tpu.memory_space<vmem>>, vector<1x8x9x64xbf16>
    %1 = vector.shape_cast %0 : vector<1x8x9x64xbf16> to vector<8x9x64xbf16>
    %c0_3 = arith.constant 0 : index
    %c0_4 = arith.constant 0 : index
    %c0_5 = arith.constant 0 : index
    %c0_6 = arith.constant 0 : index
    %2 = vector.load %arg3[%c0_3, %c0_4, %c0_5, %c0_6] : memref<1x1x9x64xbf16, #tpu.memory_space<vmem>>, vector<1x1x9x64xbf16>
    %3 = vector.shape_cast %2 : vector<1x1x9x64xbf16> to vector<1x9x64xbf16>
    %4 = vector.extract_strided_slice %1 {offsets = [1, 0, 0], sizes = [7, 9, 64], strides = [1, 1, 1]} : vector<8x9x64xbf16> to vector<7x9x64xbf16>
    %5 = tpu.concatenate %4, %3 in 0 : vector<7x9x64xbf16>, vector<1x9x64xbf16> -> vector<8x9x64xbf16>
    %6 = vector.extract_strided_slice %1 {offsets = [0, 0, 0], sizes = [8, 8, 64], strides = [1, 1, 1]} : vector<8x9x64xbf16> to vector<8x8x64xbf16>
    %7 = vector.extract_strided_slice %1 {offsets = [0, 1, 0], sizes = [8, 8, 64], strides = [1, 1, 1]} : vector<8x9x64xbf16> to vector<8x8x64xbf16>
    %8 = vector.extract_strided_slice %5 {offsets = [0, 0, 0], sizes = [8, 8, 64], strides = [1, 1, 1]} : vector<8x9x64xbf16> to vector<8x8x64xbf16>
    %9 = vector.extract_strided_slice %5 {offsets = [0, 1, 0], sizes = [8, 8, 64], strides = [1, 1, 1]} : vector<8x9x64xbf16> to vector<8x8x64xbf16>
    %10 = tpu.concatenate %6, %7, %8, %9 in 2 : vector<8x8x64xbf16>, vector<8x8x64xbf16>, vector<8x8x64xbf16>, vector<8x8x64xbf16> -> vector<8x8x256xbf16>
    %11 = vector.shape_cast %10 : vector<8x8x256xbf16> to vector<64x256xbf16>
    %c0_7 = arith.constant 0 : index
    %c0_8 = arith.constant 0 : index
    %12 = vector.load %arg4[%c0_7, %c0_8] : memref<256x32xbf16, #tpu.memory_space<vmem>>, vector<256x32xbf16>
    %cst = arith.constant dense<0.000000e+00> : vector<64x32xf32>
    %13 = tpu.matmul %11, %12, %cst {dimension_numbers = #tpu.dot_dimension_numbers<[1], [0], [0], [1], [0, 0, 1, 1], [], []>} : vector<64x256xbf16>, vector<256x32xbf16>, vector<64x32xf32> -> vector<64x32xf32>
    %c0_9 = arith.constant 0 : index
    %c0_10 = arith.constant 0 : index
    %14 = vector.load %arg5[%c0_9, %c0_10] : memref<1x32xf32, #tpu.memory_space<vmem>>, vector<1x32xf32>
    %15 = vector.broadcast %14 : vector<1x32xf32> to vector<64x32xf32>
    %16 = arith.addf %13, %15 : vector<64x32xf32>
    %cst_11 = arith.constant 0.000000e+00 : f32
    %17 = vector.broadcast %cst_11 : f32 to vector<64x32xf32>
    %18 = arith.maximumf %16, %17 : vector<64x32xf32>
    %19 = vector.shape_cast %18 : vector<64x32xf32> to vector<8x8x32xf32>
    %20 = arith.truncf %19 : vector<8x8x32xf32> to vector<8x8x32xbf16>
    %c0_12 = arith.constant 0 : index
    %c0_13 = arith.constant 0 : index
    %c0_14 = arith.constant 0 : index
    %c0_15 = arith.constant 0 : index
    %21 = vector.load %arg6[%c0_12, %c0_13, %c0_14, %c0_15] : memref<1x8x8x32xbf16, #tpu.memory_space<vmem>>, vector<1x8x8x32xbf16>
    %22 = vector.shape_cast %21 : vector<1x8x8x32xbf16> to vector<8x8x32xbf16>
    %23 = vector.shape_cast %20 : vector<8x8x32xbf16> to vector<1x8x8x32xbf16>
    tpu.vector_store %arg6[%c0_12, %c0_13, %c0_14, %c0_15], %23 {strides = array<i32>} : memref<1x8x8x32xbf16, #tpu.memory_space<vmem>>, vector<1x8x8x32xbf16>,
    return
  }
  func.func @transform_0(%arg0: i32, %arg1: i32) -> (i32, i32, i32, i32) {
    %c0_i32 = arith.constant 0 : i32
    %c0_i32_0 = arith.constant 0 : i32
    %c0_i32_1 = arith.constant 0 : i32
    return %arg0, %arg1, %c0_i32, %c0_i32_0 : i32, i32, i32, i32
  }
  func.func @transform_1(%arg0: i32, %arg1: i32) -> (i32, i32, i32, i32) {
    %c1_i32 = arith.constant 1 : i32
    %0 = arith.addi %arg1, %c1_i32 : i32
    %c8_i32 = arith.constant 8 : i32
    %1 = arith.muli %0, %c8_i32 : i32
    %c0_i32 = arith.constant 0 : i32
    %c0_i32_0 = arith.constant 0 : i32
    %c0_i32_1 = arith.constant 0 : i32
    return %arg0, %1, %c0_i32, %c0_i32_0 : i32, i32, i32, i32
  }
  func.func @transform_2(%arg0: i32, %arg1: i32) -> (i32, i32) {
    %c0_i32 = arith.constant 0 : i32
    %c0_i32_0 = arith.constant 0 : i32
    %c0_i32_1 = arith.constant 0 : i32
    return %c0_i32, %c0_i32_0 : i32, i32
  }
  func.func @transform_3(%arg0: i32, %arg1: i32) -> (i32, i32) {
    %c0_i32 = arith.constant 0 : i32
    %c0_i32_0 = arith.constant 0 : i32
    %c0_i32_1 = arith.constant 0 : i32
    return %c0_i32, %c0_i32_0 : i32, i32
  }
  func.func @transform_4(%arg0: i32, %arg1: i32) -> (i32, i32, i32, i32) {
    %c0_i32 = arith.constant 0 : i32
    %c0_i32_0 = arith.constant 0 : i32
    %c0_i32_1 = arith.constant 0 : i32
    return %arg0, %arg1, %c0_i32, %c0_i32_0 : i32, i32, i32, i32
  }
}

module attributes {stable_mosaic.version = 11 : i64} {
  func.func @_dec_head_kernel(%arg0: i32, %arg1: memref<128x32xbf16, #tpu.memory_space<vmem>>, %arg2: memref<32x32xbf16, #tpu.memory_space<vmem>>, %arg3: memref<1x32xf32, #tpu.memory_space<vmem>>, %arg4: memref<8x32xbf16, #tpu.memory_space<vmem>>, %arg5: memref<8x1xf32, #tpu.memory_space<vmem>>, %arg6: memref<8x128xf32, #tpu.memory_space<vmem>>) attributes {dimension_semantics = [#tpu.dimension_semantics<parallel>], iteration_bounds = array<i64: 1>, scalar_prefetch = 0 : i64, scratch_operands = 0 : i64, tpu.core_type = #tpu.core_type<tc>, window_params = [{transform_indices = @transform_0, window_bounds = array<i64: 128, 32>}, {pipeline_mode = #tpu.pipeline_mode<synchronous>, transform_indices = @transform_1, window_bounds = array<i64: 32, 32>}, {pipeline_mode = #tpu.pipeline_mode<synchronous>, transform_indices = @transform_2, window_bounds = array<i64: 1, 32>}, {pipeline_mode = #tpu.pipeline_mode<synchronous>, transform_indices = @transform_3, window_bounds = array<i64: 8, 32>}, {pipeline_mode = #tpu.pipeline_mode<synchronous>, transform_indices = @transform_4, window_bounds = array<i64: 8, 1>}, {transform_indices = @transform_5, window_bounds = array<i64: 8, 128>}]} {
    %c0 = arith.constant 0 : index
    %c0_0 = arith.constant 0 : index
    %0 = vector.load %arg1[%c0, %c0_0] : memref<128x32xbf16, #tpu.memory_space<vmem>>, vector<128x32xbf16>
    %c0_1 = arith.constant 0 : index
    %c0_2 = arith.constant 0 : index
    %1 = vector.load %arg2[%c0_1, %c0_2] : memref<32x32xbf16, #tpu.memory_space<vmem>>, vector<32x32xbf16>
    %cst = arith.constant dense<0.000000e+00> : vector<128x32xf32>
    %2 = tpu.matmul %0, %1, %cst {dimension_numbers = #tpu.dot_dimension_numbers<[1], [0], [0], [1], [0, 0, 1, 1], [], []>} : vector<128x32xbf16>, vector<32x32xbf16>, vector<128x32xf32> -> vector<128x32xf32>
    %c0_3 = arith.constant 0 : index
    %c0_4 = arith.constant 0 : index
    %3 = vector.load %arg3[%c0_3, %c0_4] : memref<1x32xf32, #tpu.memory_space<vmem>>, vector<1x32xf32>
    %4 = vector.broadcast %3 : vector<1x32xf32> to vector<128x32xf32>
    %5 = arith.addf %2, %4 : vector<128x32xf32>
    %cst_5 = arith.constant 0.000000e+00 : f32
    %6 = vector.broadcast %cst_5 : f32 to vector<128x32xf32>
    %7 = arith.maximumf %5, %6 : vector<128x32xf32>
    %c0_6 = arith.constant 0 : index
    %c0_7 = arith.constant 0 : index
    %8 = vector.load %arg4[%c0_6, %c0_7] : memref<8x32xbf16, #tpu.memory_space<vmem>>, vector<8x32xbf16>
    %9 = arith.truncf %7 : vector<128x32xf32> to vector<128x32xbf16>
    %cst_8 = arith.constant dense<0.000000e+00> : vector<8x128xf32>
    %10 = tpu.matmul %8, %9, %cst_8 {dimension_numbers = #tpu.dot_dimension_numbers<[1], [1], [0], [0], [0, 0, 1, 0], [], []>} : vector<8x32xbf16>, vector<128x32xbf16>, vector<8x128xf32> -> vector<8x128xf32>
    %c0_9 = arith.constant 0 : index
    %c0_10 = arith.constant 0 : index
    %11 = vector.load %arg5[%c0_9, %c0_10] : memref<8x1xf32, #tpu.memory_space<vmem>>, vector<8x1xf32>
    %12 = vector.broadcast %11 : vector<8x1xf32> to vector<8x128xf32>
    %13 = arith.addf %10, %12 : vector<8x128xf32>
    %c0_11 = arith.constant 0 : index
    %c0_12 = arith.constant 0 : index
    %14 = vector.load %arg6[%c0_11, %c0_12] : memref<8x128xf32, #tpu.memory_space<vmem>>, vector<8x128xf32>
    tpu.vector_store %arg6[%c0_11, %c0_12], %13 {strides = array<i32>} : memref<8x128xf32, #tpu.memory_space<vmem>>, vector<8x128xf32>,
    return
  }
  func.func @transform_0(%arg0: i32) -> (i32, i32) {
    %c0_i32 = arith.constant 0 : i32
    %c0_i32_0 = arith.constant 0 : i32
    return %arg0, %c0_i32 : i32, i32
  }
  func.func @transform_1(%arg0: i32) -> (i32, i32) {
    %c0_i32 = arith.constant 0 : i32
    %c0_i32_0 = arith.constant 0 : i32
    %c0_i32_1 = arith.constant 0 : i32
    return %c0_i32, %c0_i32_0 : i32, i32
  }
  func.func @transform_2(%arg0: i32) -> (i32, i32) {
    %c0_i32 = arith.constant 0 : i32
    %c0_i32_0 = arith.constant 0 : i32
    %c0_i32_1 = arith.constant 0 : i32
    return %c0_i32, %c0_i32_0 : i32, i32
  }
  func.func @transform_3(%arg0: i32) -> (i32, i32) {
    %c0_i32 = arith.constant 0 : i32
    %c0_i32_0 = arith.constant 0 : i32
    %c0_i32_1 = arith.constant 0 : i32
    return %c0_i32, %c0_i32_0 : i32, i32
  }
  func.func @transform_4(%arg0: i32) -> (i32, i32) {
    %c0_i32 = arith.constant 0 : i32
    %c0_i32_0 = arith.constant 0 : i32
    %c0_i32_1 = arith.constant 0 : i32
    return %c0_i32, %c0_i32_0 : i32, i32
  }
  func.func @transform_5(%arg0: i32) -> (i32, i32) {
    %c0_i32 = arith.constant 0 : i32
    %c0_i32_0 = arith.constant 0 : i32
    return %c0_i32, %arg0 : i32, i32
  }
}

module attributes {stable_mosaic.version = 11 : i64} {
  func.func @kernel(%arg0: i32, %arg1: memref<1x1xf32, #tpu.memory_space<smem>>, %arg2: memref<8x1x8x8xf32, #tpu.memory_space<vmem>>, %arg3: memref<16x8xf32, #tpu.memory_space<vmem>>, %arg4: memref<8x16xf32, #tpu.memory_space<vmem>>, %arg5: memref<1x16x16xf32, #tpu.memory_space<vmem>>) attributes {dimension_semantics = [#tpu.dimension_semantics<parallel>], iteration_bounds = array<i64: 2>, scalar_prefetch = 0 : i64, scratch_operands = 0 : i64, tpu.core_type = #tpu.core_type<tc>, window_params = [{transform_indices = @transform_0, window_bounds = array<i64: 1, 1>}, {transform_indices = @transform_1, window_bounds = array<i64: 8, 1, 8, 8>}, {pipeline_mode = #tpu.pipeline_mode<synchronous>, transform_indices = @transform_2, window_bounds = array<i64: 16, 8>}, {pipeline_mode = #tpu.pipeline_mode<synchronous>, transform_indices = @transform_3, window_bounds = array<i64: 8, 16>}, {transform_indices = @transform_4, window_bounds = array<i64: 1, 16, 16>}]} {
    %c0 = arith.constant 0 : index
    %c0_0 = arith.constant 0 : index
    %0 = memref.load %arg1[%c0, %c0_0] : memref<1x1xf32, #tpu.memory_space<smem>>
    %c0_1 = arith.constant 0 : index
    %c0_2 = arith.constant 0 : index
    %1 = vector.load %arg3[%c0_1, %c0_2] : memref<16x8xf32, #tpu.memory_space<vmem>>, vector<16x8xf32>
    %c0_3 = arith.constant 0 : index
    %c0_4 = arith.constant 0 : index
    %2 = vector.load %arg4[%c0_3, %c0_4] : memref<8x16xf32, #tpu.memory_space<vmem>>, vector<8x16xf32>
    %c0_5 = arith.constant 0 : index
    %c0_6 = arith.constant 0 : index
    %c0_7 = arith.constant 0 : index
    %c0_8 = arith.constant 0 : index
    %3 = vector.load %arg2[%c0_5, %c0_6, %c0_7, %c0_8] : memref<8x1x8x8xf32, #tpu.memory_space<vmem>>, vector<1x1x8x8xf32>
    %4 = vector.shape_cast %3 : vector<1x1x8x8xf32> to vector<8x8xf32>
    %cst = arith.constant dense<0.000000e+00> : vector<8x16xf32>
    %5 = tpu.matmul %4, %2, %cst {dimension_numbers = #tpu.dot_dimension_numbers<[1], [0], [0], [1], [0, 0, 1, 1], [], []>} : vector<8x8xf32>, vector<8x16xf32>, vector<8x16xf32> -> vector<8x16xf32>
    %cst_9 = arith.constant dense<0.000000e+00> : vector<16x16xf32>
    %6 = tpu.matmul %1, %5, %cst_9 {dimension_numbers = #tpu.dot_dimension_numbers<[1], [0], [0], [1], [0, 0, 1, 1], [], []>} : vector<16x8xf32>, vector<8x16xf32>, vector<16x16xf32> -> vector<16x16xf32>
    %7 = vector.broadcast %0 : f32 to vector<16x16xf32>
    %8 = arith.mulf %6, %7 : vector<16x16xf32>
    %c1 = arith.constant 1 : index
    %c0_10 = arith.constant 0 : index
    %c0_11 = arith.constant 0 : index
    %c0_12 = arith.constant 0 : index
    %9 = vector.load %arg2[%c1, %c0_10, %c0_11, %c0_12] : memref<8x1x8x8xf32, #tpu.memory_space<vmem>>, vector<1x1x8x8xf32>
    %10 = vector.shape_cast %9 : vector<1x1x8x8xf32> to vector<8x8xf32>
    %cst_13 = arith.constant dense<0.000000e+00> : vector<8x16xf32>
    %11 = tpu.matmul %10, %2, %cst_13 {dimension_numbers = #tpu.dot_dimension_numbers<[1], [0], [0], [1], [0, 0, 1, 1], [], []>} : vector<8x8xf32>, vector<8x16xf32>, vector<8x16xf32> -> vector<8x16xf32>
    %cst_14 = arith.constant dense<0.000000e+00> : vector<16x16xf32>
    %12 = tpu.matmul %1, %11, %cst_14 {dimension_numbers = #tpu.dot_dimension_numbers<[1], [0], [0], [1], [0, 0, 1, 1], [], []>} : vector<16x8xf32>, vector<8x16xf32>, vector<16x16xf32> -> vector<16x16xf32>
    %13 = vector.broadcast %0 : f32 to vector<16x16xf32>
    %14 = arith.mulf %12, %13 : vector<16x16xf32>
    %c2 = arith.constant 2 : index
    %c0_15 = arith.constant 0 : index
    %c0_16 = arith.constant 0 : index
    %c0_17 = arith.constant 0 : index
    %15 = vector.load %arg2[%c2, %c0_15, %c0_16, %c0_17] : memref<8x1x8x8xf32, #tpu.memory_space<vmem>>, vector<1x1x8x8xf32>
    %16 = vector.shape_cast %15 : vector<1x1x8x8xf32> to vector<8x8xf32>
    %cst_18 = arith.constant dense<0.000000e+00> : vector<8x16xf32>
    %17 = tpu.matmul %16, %2, %cst_18 {dimension_numbers = #tpu.dot_dimension_numbers<[1], [0], [0], [1], [0, 0, 1, 1], [], []>} : vector<8x8xf32>, vector<8x16xf32>, vector<8x16xf32> -> vector<8x16xf32>
    %cst_19 = arith.constant dense<0.000000e+00> : vector<16x16xf32>
    %18 = tpu.matmul %1, %17, %cst_19 {dimension_numbers = #tpu.dot_dimension_numbers<[1], [0], [0], [1], [0, 0, 1, 1], [], []>} : vector<16x8xf32>, vector<8x16xf32>, vector<16x16xf32> -> vector<16x16xf32>
    %19 = vector.broadcast %0 : f32 to vector<16x16xf32>
    %20 = arith.mulf %18, %19 : vector<16x16xf32>
    %c3 = arith.constant 3 : index
    %c0_20 = arith.constant 0 : index
    %c0_21 = arith.constant 0 : index
    %c0_22 = arith.constant 0 : index
    %21 = vector.load %arg2[%c3, %c0_20, %c0_21, %c0_22] : memref<8x1x8x8xf32, #tpu.memory_space<vmem>>, vector<1x1x8x8xf32>
    %22 = vector.shape_cast %21 : vector<1x1x8x8xf32> to vector<8x8xf32>
    %cst_23 = arith.constant dense<0.000000e+00> : vector<8x16xf32>
    %23 = tpu.matmul %22, %2, %cst_23 {dimension_numbers = #tpu.dot_dimension_numbers<[1], [0], [0], [1], [0, 0, 1, 1], [], []>} : vector<8x8xf32>, vector<8x16xf32>, vector<8x16xf32> -> vector<8x16xf32>
    %cst_24 = arith.constant dense<0.000000e+00> : vector<16x16xf32>
    %24 = tpu.matmul %1, %23, %cst_24 {dimension_numbers = #tpu.dot_dimension_numbers<[1], [0], [0], [1], [0, 0, 1, 1], [], []>} : vector<16x8xf32>, vector<8x16xf32>, vector<16x16xf32> -> vector<16x16xf32>
    %25 = vector.broadcast %0 : f32 to vector<16x16xf32>
    %26 = arith.mulf %24, %25 : vector<16x16xf32>
    %c4 = arith.constant 4 : index
    %c0_25 = arith.constant 0 : index
    %c0_26 = arith.constant 0 : index
    %c0_27 = arith.constant 0 : index
    %27 = vector.load %arg2[%c4, %c0_25, %c0_26, %c0_27] : memref<8x1x8x8xf32, #tpu.memory_space<vmem>>, vector<1x1x8x8xf32>
    %28 = vector.shape_cast %27 : vector<1x1x8x8xf32> to vector<8x8xf32>
    %cst_28 = arith.constant dense<0.000000e+00> : vector<8x16xf32>
    %29 = tpu.matmul %28, %2, %cst_28 {dimension_numbers = #tpu.dot_dimension_numbers<[1], [0], [0], [1], [0, 0, 1, 1], [], []>} : vector<8x8xf32>, vector<8x16xf32>, vector<8x16xf32> -> vector<8x16xf32>
    %cst_29 = arith.constant dense<0.000000e+00> : vector<16x16xf32>
    %30 = tpu.matmul %1, %29, %cst_29 {dimension_numbers = #tpu.dot_dimension_numbers<[1], [0], [0], [1], [0, 0, 1, 1], [], []>} : vector<16x8xf32>, vector<8x16xf32>, vector<16x16xf32> -> vector<16x16xf32>
    %31 = vector.broadcast %0 : f32 to vector<16x16xf32>
    %32 = arith.mulf %30, %31 : vector<16x16xf32>
    %c5 = arith.constant 5 : index
    %c0_30 = arith.constant 0 : index
    %c0_31 = arith.constant 0 : index
    %c0_32 = arith.constant 0 : index
    %33 = vector.load %arg2[%c5, %c0_30, %c0_31, %c0_32] : memref<8x1x8x8xf32, #tpu.memory_space<vmem>>, vector<1x1x8x8xf32>
    %34 = vector.shape_cast %33 : vector<1x1x8x8xf32> to vector<8x8xf32>
    %cst_33 = arith.constant dense<0.000000e+00> : vector<8x16xf32>
    %35 = tpu.matmul %34, %2, %cst_33 {dimension_numbers = #tpu.dot_dimension_numbers<[1], [0], [0], [1], [0, 0, 1, 1], [], []>} : vector<8x8xf32>, vector<8x16xf32>, vector<8x16xf32> -> vector<8x16xf32>
    %cst_34 = arith.constant dense<0.000000e+00> : vector<16x16xf32>
    %36 = tpu.matmul %1, %35, %cst_34 {dimension_numbers = #tpu.dot_dimension_numbers<[1], [0], [0], [1], [0, 0, 1, 1], [], []>} : vector<16x8xf32>, vector<8x16xf32>, vector<16x16xf32> -> vector<16x16xf32>
    %37 = vector.broadcast %0 : f32 to vector<16x16xf32>
    %38 = arith.mulf %36, %37 : vector<16x16xf32>
    %c6 = arith.constant 6 : index
    %c0_35 = arith.constant 0 : index
    %c0_36 = arith.constant 0 : index
    %c0_37 = arith.constant 0 : index
    %39 = vector.load %arg2[%c6, %c0_35, %c0_36, %c0_37] : memref<8x1x8x8xf32, #tpu.memory_space<vmem>>, vector<1x1x8x8xf32>
    %40 = vector.shape_cast %39 : vector<1x1x8x8xf32> to vector<8x8xf32>
    %cst_38 = arith.constant dense<0.000000e+00> : vector<8x16xf32>
    %41 = tpu.matmul %40, %2, %cst_38 {dimension_numbers = #tpu.dot_dimension_numbers<[1], [0], [0], [1], [0, 0, 1, 1], [], []>} : vector<8x8xf32>, vector<8x16xf32>, vector<8x16xf32> -> vector<8x16xf32>
    %cst_39 = arith.constant dense<0.000000e+00> : vector<16x16xf32>
    %42 = tpu.matmul %1, %41, %cst_39 {dimension_numbers = #tpu.dot_dimension_numbers<[1], [0], [0], [1], [0, 0, 1, 1], [], []>} : vector<16x8xf32>, vector<8x16xf32>, vector<16x16xf32> -> vector<16x16xf32>
    %43 = vector.broadcast %0 : f32 to vector<16x16xf32>
    %44 = arith.mulf %42, %43 : vector<16x16xf32>
    %c7 = arith.constant 7 : index
    %c0_40 = arith.constant 0 : index
    %c0_41 = arith.constant 0 : index
    %c0_42 = arith.constant 0 : index
    %45 = vector.load %arg2[%c7, %c0_40, %c0_41, %c0_42] : memref<8x1x8x8xf32, #tpu.memory_space<vmem>>, vector<1x1x8x8xf32>
    %46 = vector.shape_cast %45 : vector<1x1x8x8xf32> to vector<8x8xf32>
    %cst_43 = arith.constant dense<0.000000e+00> : vector<8x16xf32>
    %47 = tpu.matmul %46, %2, %cst_43 {dimension_numbers = #tpu.dot_dimension_numbers<[1], [0], [0], [1], [0, 0, 1, 1], [], []>} : vector<8x8xf32>, vector<8x16xf32>, vector<8x16xf32> -> vector<8x16xf32>
    %cst_44 = arith.constant dense<0.000000e+00> : vector<16x16xf32>
    %48 = tpu.matmul %1, %47, %cst_44 {dimension_numbers = #tpu.dot_dimension_numbers<[1], [0], [0], [1], [0, 0, 1, 1], [], []>} : vector<16x8xf32>, vector<8x16xf32>, vector<16x16xf32> -> vector<16x16xf32>
    %49 = vector.broadcast %0 : f32 to vector<16x16xf32>
    %50 = arith.mulf %48, %49 : vector<16x16xf32>
    %51 = arith.maximumf %8, %14 : vector<16x16xf32>
    %52 = arith.maximumf %51, %20 : vector<16x16xf32>
    %53 = arith.maximumf %52, %26 : vector<16x16xf32>
    %54 = arith.maximumf %53, %32 : vector<16x16xf32>
    %55 = arith.maximumf %54, %38 : vector<16x16xf32>
    %56 = arith.maximumf %55, %44 : vector<16x16xf32>
    %57 = arith.maximumf %56, %50 : vector<16x16xf32>
    %cst_45 = arith.constant 0.000000e+00 : f32
    %58 = vector.broadcast %cst_45 : f32 to vector<16x16xf32>
    %cst_46 = arith.constant 0.000000e+00 : f32
    %59 = vector.broadcast %cst_46 : f32 to vector<16x16xf32>
    %60 = arith.subf %8, %57 : vector<16x16xf32>
    %61 = math.exp %60 : vector<16x16xf32>
    %62 = arith.addf %58, %61 : vector<16x16xf32>
    %cst_47 = arith.constant 1.16676068 : f32
    %63 = vector.broadcast %cst_47 : f32 to vector<16x16xf32>
    %64 = arith.mulf %61, %63 : vector<16x16xf32>
    %65 = arith.addf %59, %64 : vector<16x16xf32>
    %66 = arith.subf %14, %57 : vector<16x16xf32>
    %67 = math.exp %66 : vector<16x16xf32>
    %68 = arith.addf %62, %67 : vector<16x16xf32>
    %cst_48 = arith.constant 1.55590045 : f32
    %69 = vector.broadcast %cst_48 : f32 to vector<16x16xf32>
    %70 = arith.mulf %67, %69 : vector<16x16xf32>
    %71 = arith.addf %65, %70 : vector<16x16xf32>
    %72 = arith.subf %20, %57 : vector<16x16xf32>
    %73 = math.exp %72 : vector<16x16xf32>
    %74 = arith.addf %68, %73 : vector<16x16xf32>
    %cst_49 = arith.constant 2.07482648 : f32
    %75 = vector.broadcast %cst_49 : f32 to vector<16x16xf32>
    %76 = arith.mulf %73, %75 : vector<16x16xf32>
    %77 = arith.addf %71, %76 : vector<16x16xf32>
    %78 = arith.subf %26, %57 : vector<16x16xf32>
    %79 = math.exp %78 : vector<16x16xf32>
    %80 = arith.addf %74, %79 : vector<16x16xf32>
    %cst_50 = arith.constant 2.76682568 : f32
    %81 = vector.broadcast %cst_50 : f32 to vector<16x16xf32>
    %82 = arith.mulf %79, %81 : vector<16x16xf32>
    %83 = arith.addf %77, %82 : vector<16x16xf32>
    %84 = arith.subf %32, %57 : vector<16x16xf32>
    %85 = math.exp %84 : vector<16x16xf32>
    %86 = arith.addf %80, %85 : vector<16x16xf32>
    %cst_51 = arith.constant 3.68962145 : f32
    %87 = vector.broadcast %cst_51 : f32 to vector<16x16xf32>
    %88 = arith.mulf %85, %87 : vector<16x16xf32>
    %89 = arith.addf %83, %88 : vector<16x16xf32>
    %90 = arith.subf %38, %57 : vector<16x16xf32>
    %91 = math.exp %90 : vector<16x16xf32>
    %92 = arith.addf %86, %91 : vector<16x16xf32>
    %cst_52 = arith.constant 4.92018938 : f32
    %93 = vector.broadcast %cst_52 : f32 to vector<16x16xf32>
    %94 = arith.mulf %91, %93 : vector<16x16xf32>
    %95 = arith.addf %89, %94 : vector<16x16xf32>
    %96 = arith.subf %44, %57 : vector<16x16xf32>
    %97 = math.exp %96 : vector<16x16xf32>
    %98 = arith.addf %92, %97 : vector<16x16xf32>
    %cst_53 = arith.constant 6.56117773 : f32
    %99 = vector.broadcast %cst_53 : f32 to vector<16x16xf32>
    %100 = arith.mulf %97, %99 : vector<16x16xf32>
    %101 = arith.addf %95, %100 : vector<16x16xf32>
    %102 = arith.subf %50, %57 : vector<16x16xf32>
    %103 = math.exp %102 : vector<16x16xf32>
    %104 = arith.addf %98, %103 : vector<16x16xf32>
    %cst_54 = arith.constant 8.74947071 : f32
    %105 = vector.broadcast %cst_54 : f32 to vector<16x16xf32>
    %106 = arith.mulf %103, %105 : vector<16x16xf32>
    %107 = arith.addf %101, %106 : vector<16x16xf32>
    %108 = tpu.reciprocal %104 {approx = true} : vector<16x16xf32> -> vector<16x16xf32>
    %109 = arith.mulf %107, %108 : vector<16x16xf32>
    %c0_55 = arith.constant 0 : index
    %c0_56 = arith.constant 0 : index
    %c0_57 = arith.constant 0 : index
    %110 = vector.load %arg5[%c0_55, %c0_56, %c0_57] : memref<1x16x16xf32, #tpu.memory_space<vmem>>, vector<1x16x16xf32>
    %111 = vector.shape_cast %110 : vector<1x16x16xf32> to vector<16x16xf32>
    %112 = vector.shape_cast %109 : vector<16x16xf32> to vector<1x16x16xf32>
    tpu.vector_store %arg5[%c0_55, %c0_56, %c0_57], %112 {strides = array<i32>} : memref<1x16x16xf32, #tpu.memory_space<vmem>>, vector<1x16x16xf32>,
    return
  }
  func.func @transform_0(%arg0: i32) -> (i32, i32) {
    %c0_i32 = arith.constant 0 : i32
    %c0_i32_0 = arith.constant 0 : i32
    %c0_i32_1 = arith.constant 0 : i32
    return %c0_i32, %c0_i32_0 : i32, i32
  }
  func.func @transform_1(%arg0: i32) -> (i32, i32, i32, i32) {
    %c0_i32 = arith.constant 0 : i32
    %c0_i32_0 = arith.constant 0 : i32
    %c0_i32_1 = arith.constant 0 : i32
    %c0_i32_2 = arith.constant 0 : i32
    return %c0_i32, %arg0, %c0_i32_0, %c0_i32_1 : i32, i32, i32, i32
  }
  func.func @transform_2(%arg0: i32) -> (i32, i32) {
    %c0_i32 = arith.constant 0 : i32
    %c0_i32_0 = arith.constant 0 : i32
    %c0_i32_1 = arith.constant 0 : i32
    return %c0_i32, %c0_i32_0 : i32, i32
  }
  func.func @transform_3(%arg0: i32) -> (i32, i32) {
    %c0_i32 = arith.constant 0 : i32
    %c0_i32_0 = arith.constant 0 : i32
    %c0_i32_1 = arith.constant 0 : i32
    return %c0_i32, %c0_i32_0 : i32, i32
  }
  func.func @transform_4(%arg0: i32) -> (i32, i32, i32) {
    %c0_i32 = arith.constant 0 : i32
    %c0_i32_0 = arith.constant 0 : i32
    %c0_i32_1 = arith.constant 0 : i32
    return %arg0, %c0_i32, %c0_i32_0 : i32, i32, i32
  }
}

</mosaic_0001>

<bundles_post_ra>
// kernel: _lambda_.4
= control target key start
LH: loop header
LB: loop body
LE: loop exit
PB: predicated region body
PF: predicated region fallthrough
CT: control target
= control target key end

     0   :  { %s1117_s15 = smov 0   ;;  %s1119_s16 = smov 0   ;;  %s1401_s0 = inlined_call_operand.vmem [shape: bf16[2,17,17,16], index: 0, kind: input, shape index: {}, may-alias: {0,1}]   ;;  %s1402_s1 = inlined_call_operand.vmem [shape: bf16[2,17,17,16], index: 1, kind: input, shape index: {}, may-alias: {0,1}]   ;;  %s1403_s2 = inlined_call_operand.vmem [shape: bf16[64,16], index: 2, kind: input, shape index: {}]   ;;  %s1404_s3 = inlined_call_operand.vmem [shape: f32[1,16], index: 3, kind: input, shape index: {}]   ;;  %s1405_s4 = inlined_call_operand.vmem [shape: bf16[2,16,16,16], index: 4, kind: output, shape index: {}]  }
   0x1   :  { %s1121_s17 = smov 0   ;;  %s1123_s18 = smov 0  }
   0x2   :  { %s1125_s19 = smov 0  }
   0x3 LB: > { %s23_s20 = sadd.s32 1, %s1079_s17  ;;  %s26_s21 = sadd.s32 1, %s1083_s18  ;;  %s1087_s19 = sphi %s1125_s19, %s14_s19   ;;  %s1083_s18 = sphi %s1123_s18, %s1410_s18   ;;  %s1079_s17 = sphi %s1121_s17, %s1409_s17   ;;  %s1075_s16 = sphi %s1119_s16, %s1408_s16   ;;  %s1071_s15 = sphi %s1117_s15, %s1407_s15  }
   0x4   : > { %p24_p0 = scmp.ge.s32.totalorder %s23_s20, 2  ;;  %p900_p1 = scmp.ge.s32.totalorder %s1087_s19, 1 }
   0x5   : > { %p218_p2 = scmp.lt.s32.totalorder %s1087_s19, 5 }
   0x6   : > { %s1412_s20 = smov (%p24_p0, %s23_s20), 0  ;;  %s1414_s21 = smov (!%p24_p0, %s26_s21), %s1083_s18 }
   0x7   : > { %p219_p3 = pnand %p900_p1, %p218_p2  ;;  %p28_p4 = scmp.ge.s32.totalorder %s1414_s21, 2 }
   0x8   : > { %s1147_s22 = sshll.u32 (!%p219_p3), %s1071_s15, 3  ;;  %p276_p5 = scmp.lt.s32.totalorder (!%p219_p3), %s1075_s16, 1 }
   0x9   : > { %s1416_s21 = smov (%p28_p4, %s1414_s21), 0  ;;  %222 = sbr.rel (%p219_p3) target bundleno = 346 (0x15a), region = 36 }
   0xa   : > { %p278_p6 = scmp.lt.s32.totalorder (!%p219_p3), %s1147_s22, 16  ;;  %s1089_s5 = smov (!%p219_p3), 32  }
   0xb   : > { %s1090_s6 = smov (!%p219_p3), 16   ;;  %s976_s7 = sadd.s32 (!%p219_p3), 8, %s1147_s22 }
   0xc   : > { %p1216_p7 = scmp.lt.s32.totalorder (!%p219_p3), %s976_s7, 16  ;;  %s1091_s9 = smov (!%p219_p3), 48  }
   0xd   : > { %p307_p8 = scmp.lt.s32.totalorder (!%p219_p3), %s1147_s22, 15 }
   0xe   : > { %s1418_s16 = smov (!%p276_p5, %s1075_s16), 1  ;;  %vm407_vm0 = vsmask.f32 7424  ;;  %s1420_s7 = smov (!%p1216_p7, %s976_s7), 16  ;;  %vm572_vm1 = vcmask 130048   ;;  %vm589_vm2 = vcmask 261120  }
   0xf   : > { %s279_s23 = scalar_select %p278_p6, %s1147_s22, 16  ;;  %vm606_vm3 = vcmask 392192   ;;  %vm659_vm4 = vcmask 523264   ;;  %vm757_vm5 = vcmask 125952  }
  0x10   : > { %s1003_s24 = smul.u32 51, %s1418_s16  ;;  %s1422_s22 = smov (!%p307_p8, %s1147_s22), 15 }
  0x11   : > { %s1002_s25 = smul.u32 3, %s279_s23 }
  0x12   : > { %s1004_s10 = smul.u32 3, %s1420_s7 }
  0x13   : > { %s282_s26 = sadd.s32 %s1003_s24, %s1002_s25 }
  0x14   : > { %s902_s27 = sshll.u32 %s282_s26, 2  ;;  %s299_s11 = sadd.s32 %s1004_s10, %s1003_s24 }
  0x15   : > { %s1159_s30 = scalar_lea.vmem %s1401_s0, %s902_s27  ;;  %s904_s12 = sshll.u32 %s299_s11, 2 }
  0x16   : > { %v1162_v0 = vld [vmem:[%s1159_s30 + $0x3c] sm:$0xff]  ;;  %v1165_v1 = vld [vmem:[%s1159_s30 + $0x30] sm:$0xff]  ;;  %v330_v2 = vld [vmem:[%s1159_s30 + $0x38] sm:$0x1]  ;;  %s301_s15 = scalar_lea.vmem %s1402_s1, %s904_s12 }
  0x17   : > { %v395_v3 = vunpack.c.l.b16 %v330_v2  ;;  %v1169_v4 = vld [vmem:[%s1159_s30 + $0x48] sm:$0xff]  ;;  %v336_v5 = vld [vmem:[%s1159_s30 + $0x50] sm:$0x1]  ;;  %533 = vrot.lane.b32.xlu1 %v1162_v0, %s1089_s5  ;;  %v457_v6 = vshrl.u32 %v1165_v1, 16  ;;  %v459_v7 = vshll.u32 %v1165_v1, 16  ;;  %v1177_v9 = vld [vmem:[%s1159_s30 + $0x18] sm:$0xff] }
  0x18   : > { %v397_v8 = vunpack.c.l.b16 %v336_v5  ;;  %v324_v10 = vld [vmem:[%s1159_s30 + $0x20] sm:$0x1]  ;;  %v483_v12 = vshll.u32 %v1169_v4, 16  ;;  %v318_v14 = vld [vmem:[%s1159_s30 + $0x8] sm:$0x1]  ;;  %v1183_v15 = vld [vmem:[%s1159_s30 + $0xc] sm:$0xff] }
  0x19   : > { %v403_v11 = vpack.c.b16 %v395_v3, %v395_v3  ;;  %v393_v13 = vunpack.c.l.b16 %v324_v10  ;;  %v461_v16 = vrot.slane %v459_v7, 1  ;;  %v481_v18 = vshrl.u32 %v1169_v4, 16  ;;  %525 = vrot.lane.b32.xlu2 %v1183_v15, %s1089_s5  ;;  %v321_v24 = vld [vmem:[%s1159_s30 + $0x14] sm:$0x1]  ;;  %v1194_v28 = vld [vmem:[%s1159_s30] sm:$0xff] }
  0x1a   : > { %v405_v17 = vpack.c.b16 %v397_v8, %v397_v8  ;;  %v435_v19 = vshll.u32 %v1177_v9, 16  ;;  %v485_v21 = vrot.slane %v483_v12, 1  ;;  %v391_v23 = vunpack.c.l.b16 %v318_v14  ;;  %v1191_v26 = vld [vmem:[%s1159_s30 + $0x54] sm:$0xff]  ;;  %v333_v35 = vld [vmem:[%s1159_s30 + $0x44] sm:$0x1] }
  0x1b   : > { %v464_v20 = vshll.u32 %v403_v11, 16  ;;  %v401_v22 = vpack.c.b16 %v393_v13, %v393_v13  ;;  %v462_v25 = vor.u32 %v461_v16, %v457_v6  ;;  %v433_v30 = vshrl.u32 %v1177_v9, 16  ;;  %v339_v42 = vld [vmem:[%s1159_s30 + $0x5c] sm:$0x1]  ;;  %v327_v63 = vld [vmem:[%s1159_s30 + $0x2c] sm:$0x1] }
  0x1c   : > { %v488_v27 = vshll.u32 %v405_v17, 16  ;;  %v437_v31 = vrot.slane %v435_v19, 1  ;;  %v399_v33 = vpack.c.b16 %v391_v23, %v391_v23  ;;  %v392_v34 = vunpack.c.l.b16 %v321_v24  ;;  %v1235_v14 = vld [vmem:[%s1159_s30 + $0x24] sm:$0xff] }
  0x1d   : > { %v466_v29 = vrot.slane %v464_v20, 1  ;;  %v440_v32 = vshll.u32 %v401_v22, 16  ;;  %v486_v37 = vor.u32 %v485_v21, %v481_v18  ;;  %v411_v39 = vshll.u32 %v1194_v28, 16 }
  0x1e   : > { %v490_v38 = vrot.slane %v488_v27, 1  ;;  %v400_v40 = vpack.c.b16 %v392_v34, %v392_v34  ;;  %v423_v41 = vshll.u32 %v1183_v15, 16  ;;  %v438_v43 = vor.u32 %v437_v31, %v433_v30  ;;  %v342_v30 = vld [vmem:[%s301_s15 + $0x8] sm:$0x1]  ;;  %v989_v34 = vld [vmem:[%s1403_s2 + $0x18] sm:$0xff] }
  0x1f   : > { %v1199_v36 = vsel %vm407_vm0, %v462_v25, %v466_v29  ;;  %537 = vrot.lane.b32.xlu1 %v1191_v26, %s1089_s5  ;;  %v442_v44 = vrot.slane %v440_v32, 1  ;;  %v396_v45 = vunpack.c.l.b16 %v333_v35  ;;  %v409_v46 = vshrl.u32 %v1194_v28, 16  ;;  %v985_v32 = vld [vmem:[%s301_s15] sm:$0xff]  ;;  %991 = vmatpush.bf16.msra.mxu2 %v989_v34 }
  0x20   : > { %512 = vrot.lane.b32.xlu0 %v1199_v36, %s1090_s6  ;;  %v416_v47 = vshll.u32 %v399_v33, 16  ;;  %v469_v48 = vshrl.u32 %v1162_v0, 16  ;;  %v471_v49 = vshll.u32 %v1162_v0, 16  ;;  %v1213_v50 = vsel %vm407_vm0, %v486_v37, %v490_v38  ;;  %992 = vmatpush.bf16.msra.mxu3 %v989_v34  ;;  %v988_v38 = vld [vmem:[%s1403_s2 + $0x10] sm:$0xff] }
  0x21   : > { %v421_v51 = vshrl.u32 %v1183_v15, 16  ;;  %v404_v52 = vpack.c.b16 %v396_v45, %v396_v45  ;;  %v398_v53 = vunpack.c.l.b16 %v339_v42  ;;  %v413_v54 = vrot.slane %v411_v39, 1  ;;  %680 = vmatpush.bf16.msra.mxu0 %v989_v34  ;;  %990 = vmatpush.bf16.msra.mxu1 %v989_v34  ;;  %v987_v45 = vld [vmem:[%s1403_s2 + $0x8] sm:$0xff] }
  0x22   : > { %v425_v55 = vrot.slane %v423_v41, 1  ;;  %v428_v56 = vshll.u32 %v400_v40, 16  ;;  %v473_v57 = vrot.slane %v471_v49, 1  ;;  %v1221_v58 = vsel %vm407_vm0, %v438_v43, %v442_v44 }
  0x23   : > { %v476_v59 = vshll.u32 %v404_v52, 16  ;;  %v406_v60 = vpack.c.b16 %v398_v53, %v398_v53  ;;  %v495_v61 = vshll.u32 %v1191_v26, 16  ;;  %v418_v2 = vrot.slane %v416_v47, 1  ;;  %994 = vmatpush.bf16.msra.mxu2 %v988_v38 }
  0x24   : > { %v474_v62 = vor.u32 %v473_v57, %v469_v48  ;;  %v414_v5 = vor.u32 %v413_v54, %v409_v46  ;;  %v426_v6 = vor.u32 %v425_v55, %v421_v51  ;;  %v430_v7 = vrot.slane %v428_v56, 1  ;;  %995 = vmatpush.bf16.msra.mxu3 %v988_v38  ;;  %v986_v46 = vld [vmem:[%s1403_s2] sm:$0xff] }
  0x25   : > { %v478_v3 = vrot.slane %v476_v59, 1  ;;  %v493_v8 = vshrl.u32 %v1191_v26, 16  ;;  %v497_v11 = vrot.slane %v495_v61, 1  ;;  %v500_v12 = vshll.u32 %v406_v60, 16  ;;  %681 = vmatpush.bf16.msra.mxu0 %v988_v38  ;;  %993 = vmatpush.bf16.msra.mxu1 %v988_v38 }
  0x26   : > { %v394_v13 = vunpack.c.l.b16 %v327_v63  ;;  %v419_v16 = vsel %vm407_vm0, %v414_v5, %v418_v2  ;;  %v431_v17 = vsel %vm407_vm0, %v426_v6, %v430_v7  ;;  %v447_v21 = vshll.u32 %v1235_v14, 16 }
  0x27   : > { %508 = vrot.lane.b32.xlu1 %v1221_v58, %s1090_s6  ;;  %v479_v10 = vsel %vm407_vm0, %v474_v62, %v478_v3  ;;  %v498_v18 = vor.u32 %v497_v11, %v493_v8  ;;  %v502_v19 = vrot.slane %v500_v12, 1  ;;  %v445_v23 = vshrl.u32 %v1235_v14, 16  ;;  %997 = vmatpush.bf16.msra.mxu2 %v987_v45 }
  0x28   : > { %516 = vrot.lane.b32.xlu0 %v1213_v50, %s1090_s6  ;;  %564 = vrot.lane.b32.xlu2 %v479_v10, %s1091_s9  ;;  %v402_v20 = vpack.c.b16 %v394_v13, %v394_v13  ;;  %v449_v24 = vrot.slane %v447_v21, 1  ;;  %v542_v31 = vunpack.c.l.b16 %v342_v30  ;;  %v547_v35 = vshll.u32 %v985_v32, 16 }
  0x29   : > { %v503_v22 = vsel %vm407_vm0, %v498_v18, %v502_v19  ;;  %v545_v39 = vshrl.u32 %v985_v32, 16  ;;  %998 = vmatpush.bf16.msra.mxu3 %v987_v45  ;;  %682 = vmatpush.bf16.msra.mxu0 %v987_v45 }
  0x2a   : > { %v452_v25 = vshll.u32 %v402_v20, 16  ;;  %v450_v27 = vor.u32 %v449_v24, %v445_v23  ;;  %v543_v37 = vpack.c.b16 %v542_v31, %v542_v31  ;;  %v549_v40 = vrot.slane %v547_v35, 1  ;;  %996 = vmatpush.bf16.msra.mxu1 %v987_v45 }
  0x2b   : > { %1000 = vmatpush.bf16.msra.mxu2 %v986_v46 }
  0x2c   : > { %v454_v29 = vrot.slane %v452_v25, 1  ;;  %v552_v41 = vshll.u32 %v543_v37, 16  ;;  %v550_v42 = vor.u32 %v549_v40, %v545_v39 }
  0x2d   : > { %1001 = vmatpush.bf16.msra.mxu3 %v986_v46  ;;  %683 = vmatpush.bf16.msra.mxu0 %v986_v46 }
  0x2e   : > { %v455_v33 = vsel %vm407_vm0, %v450_v27, %v454_v29  ;;  %v554_v43 = vrot.slane %v552_v41, 1  ;;  %999 = vmatpush.bf16.msra.mxu1 %v986_v46 }
  0x2f   : > { %556 = vrot.lane.b32.xlu1 %v431_v17, %s1091_s9 }
  0x30   : > { %504 = vrot.lane.b32.xlu0 %v419_v16, %s1090_s6  ;;  %568 = vrot.lane.b32.xlu2 %v503_v22, %s1091_s9  ;;  %v555_v44 = vsel %vm407_vm0, %v550_v42, %v554_v43 }
  0x37   : > { %518 = vrot.lane.b32.xlu1 %v503_v22, %s1090_s6 }
  0x38   : > { %529 = vrot.lane.b32.xlu0 %v1235_v14, %s1089_s5  ;;  %560 = vrot.lane.b32.xlu2 %v455_v33, %s1091_s9 }
  0x3f   : > { %566 = vrot.lane.b32.xlu1 %v1213_v50, %s1091_s9 }
  0x40   : > { %514 = vrot.lane.b32.xlu0 %v479_v10, %s1090_s6  ;;  %535 = vrot.lane.b32.xlu2 %v1169_v4, %s1089_s5 }
  0x47   : > { %510 = vrot.lane.b32.xlu1 %v455_v33, %s1090_s6 }
  0x48   : > { %539 = vrot.lane.b32.xlu0 %v985_v32, %s1089_s5  ;;  %570 = vrot.lane.b32.xlu2 %v555_v44, %s1091_s9 }
  0x4f   : > { %558 = vrot.lane.b32.xlu1 %v1221_v58, %s1091_s9 }
  0x50   : > { %506 = vrot.lane.b32.xlu0 %v431_v17, %s1090_s6  ;;  %527 = vrot.lane.b32.xlu2 %v1177_v9, %s1089_s5  ;;  %s907_s6 = sshll.u32 %s1418_s16, 5 }
  0x58   : > { %531 = vrot.lane.b32.xlu0 %v1165_v1, %s1089_s5  ;;  %562 = vrot.lane.b32.xlu2 %v1199_v36, %s1091_s9  ;;  %s906_s5 = sshll.u32 %s1422_s22, 1 }
  0x59   : > { %s311_s9 = sadd.s32 %s907_s6, %s906_s5 }
  0x5a   : > { %s908_s10 = sshll.u32 %s311_s9, 2 }
  0x5b   : > { %s1337_s13 = scalar_lea.vmem %s1405_s4, %s908_s10 }
  0x73   : > { %v526_v47 = vpop.permute.xlu2 %525 }
  0x82   : > { %v565_v49 = vpop.permute.xlu2 %564 }
  0x89   : > { %v534_v48 = vpop.permute.xlu1 %533 }
  0x8a   : > { %v569_v54 = vpop.permute.xlu2 %568 }
  0x91   : > { %v538_v50 = vpop.permute.xlu1 %537 }
  0x92   : > { %v513_v36 = vpop.permute.xlu0 %512 }
  0x93   : > { %v582_v51 = vsel %vm572_vm1, %v1165_v1, %v513_v36  ;;  %v561_v1 = vpop.permute.xlu2 %560 }
  0x94   : > { %v599_v52 = vsel %vm589_vm2, %v582_v51, %v534_v48 }
  0x95   : > { %v616_v53 = vsel %vm606_vm3, %v599_v52, %v565_v49 }
  0x96   : > { %965 = vmatmul.msk.bf16.vlgmr.msra.gmra.mxu2 %vm659_vm4, %v616_v53 }
  0x99   : > { %v509_v56 = vpop.permute.xlu1 %508 }
  0x9a   : > { %v517_v55 = vpop.permute.xlu0 %516 }
  0x9b   : > { %v586_v57 = vsel %vm572_vm1, %v1169_v4, %v517_v55  ;;  %v578_v4 = vsel %vm572_vm1, %v1177_v9, %v509_v56  ;;  %v536_v7 = vpop.permute.xlu2 %535 }
  0x9c   : > { %v603_v58 = vsel %vm589_vm2, %v586_v57, %v538_v50 }
  0x9d   : > { %v620_v59 = vsel %vm606_vm3, %v603_v58, %v569_v54 }
  0x9e   : > { %967 = vmatmul.msk.bf16.vlgmr.msra.gmra.mxu3 %vm659_vm4, %v620_v59 }
  0xa1   : > { %v557_v61 = vpop.permute.xlu1 %556 }
  0xa2   : > { %v505_v60 = vpop.permute.xlu0 %504 }
  0xa3   : > { %v574_v62 = vsel %vm572_vm1, %v1194_v28, %v505_v60  ;;  %v571_v16 = vpop.permute.xlu2 %570 }
  0xa4   : > { %v591_v63 = vsel %vm589_vm2, %v574_v62, %v526_v47 }
  0xa5   : > { %v608_v2 = vsel %vm606_vm3, %v591_v63, %v557_v61 }
  0xa6   : > { %961 = vmatmul.msk.bf16.vlgmr.msra.gmra.mxu0 %vm659_vm4, %v608_v2 }
  0xa9   : > { %v519_v5 = vpop.permute.xlu1 %518 }
  0xaa   : > { %v530_v3 = vpop.permute.xlu0 %529  ;;  %v588_v9 = vsel %vm572_vm1, %v1191_v26, %v519_v5 }
  0xab   : > { %v595_v6 = vsel %vm589_vm2, %v578_v4, %v530_v3 }
  0xac   : > { %v612_v8 = vsel %vm606_vm3, %v595_v6, %v561_v1 }
  0xad   : > { %963 = vmatmul.msk.bf16.vlgmr.msra.gmra.mxu1 %vm659_vm4, %v612_v8 }
  0xb1   : > { %v567_v28 = vpop.permute.xlu1 %566 }
  0xb2   : > { %v515_v10 = vpop.permute.xlu0 %514 }
  0xb3   : > { %v584_v11 = vsel %vm572_vm1, %v1162_v0, %v515_v10  ;;  %v528_v0 = vpop.permute.xlu2 %527 }
  0xb4   : > { %v601_v12 = vsel %vm589_vm2, %v584_v11, %v536_v7 }
  0xb5   : > { %v618_v13 = vsel %vm606_vm3, %v601_v12, %v567_v28 }
  0xb6   : > { %966 = vmatmul.msk.bf16.gmra.mxu2 %vm659_vm4, %v618_v13 }
  0xb9   : > { %v511_v18 = vpop.permute.xlu1 %510 }
  0xba   : > { %v540_v17 = vpop.permute.xlu0 %539  ;;  %v580_v27 = vsel %vm572_vm1, %v1235_v14, %v511_v18 }
  0xbb   : > { %v605_v19 = vsel %vm589_vm2, %v588_v9, %v540_v17  ;;  %v563_v25 = vpop.permute.xlu2 %562 }
  0xbc   : > { %v622_v20 = vsel %vm606_vm3, %v605_v19, %v571_v16 }
  0xbd   : > { %968 = vmatmul.msk.bf16.gmra.mxu3 %vm659_vm4, %v622_v20 }
  0xc1   : > { %v559_v22 = vpop.permute.xlu1 %558 }
  0xc2   : > { %v507_v21 = vpop.permute.xlu0 %506 }
  0xc3   : > { %v576_v23 = vsel %vm572_vm1, %v1183_v15, %v507_v21  ;;  %v1331_v15 = vld [vmem:[%s1404_s3] ss:$0 sm:$0xff] }
  0xc4   : > { %v593_v24 = vsel %vm589_vm2, %v576_v23, %v528_v0 }
  0xc5   : > { %v610_v26 = vsel %vm606_vm3, %v593_v24, %v559_v22 }
  0xc6   : > { %962 = vmatmul.msk.bf16.gmra.mxu0 %vm659_vm4, %v610_v26 }
  0xca   : > { %v532_v29 = vpop.permute.xlu0 %531 }
  0xcb   : > { %v597_v30 = vsel %vm589_vm2, %v580_v27, %v532_v29 }
  0xcc   : > { %v614_v31 = vsel %vm606_vm3, %v597_v30, %v563_v25 }
  0xcd   : > { %964 = vmatmul.msk.bf16.gmra.mxu1 %vm659_vm4, %v614_v31 }
 0x119   : > { %v705_v32 = vpop.f32.mrf.mxu2 }
 0x11a   : > { %v706_v14 = vadd.f32 %v1331_v15, %v705_v32 }
 0x11c   : > { %v733_v33 = vmax.f32 %v706_v14, 0.0 }
 0x11e   : > { %v749_v34 = vpack.c.bf16 %v733_v33, %v733_v33 }
 0x120   : > { %766 = vst.msk [vmem:[%s1337_s13 + $0x20] sm:$0xf] %vm757_vm5, %v749_v34 }
 0x121   : > { %v707_v35 = vpop.f32.mrf.mxu2  ;;  %v715_v37 = vpop.f32.mrf.mxu3 }
 0x122   : > { %v708_v38 = vadd.f32 %v1331_v15, %v707_v35  ;;  %v716_v39 = vadd.f32 %v1331_v15, %v715_v37 }
 0x123   : > { %v685_v40 = vpop.f32.mrf.mxu0 }
 0x124   : > { %v734_v41 = vmax.f32 %v708_v38, 0.0  ;;  %v737_v42 = vmax.f32 %v716_v39, 0.0  ;;  %v686_v43 = vadd.f32 %v1331_v15, %v685_v40 }
 0x126   : > { %v750_v44 = vpack.c.bf16 %v734_v41, %v734_v41  ;;  %v753_v45 = vpack.c.bf16 %v737_v42, %v737_v42  ;;  %v725_v46 = vmax.f32 %v686_v43, 0.0 }
 0x128   : > { %767 = vst.msk [vmem:[%s1337_s13 + $0x24] sm:$0xf] %vm757_vm5, %v750_v44  ;;  %v741_v47 = vpack.c.bf16 %v725_v46, %v725_v46 }
 0x129   : > { %770 = vst.msk [vmem:[%s1337_s13 + $0x30] sm:$0xf] %vm757_vm5, %v753_v45  ;;  %v717_v48 = vpop.f32.mrf.mxu3 }
 0x12a   : > { %758 = vst.msk [vmem:[%s1337_s13] sm:$0xf] %vm757_vm5, %v741_v47  ;;  %v718_v49 = vadd.f32 %v1331_v15, %v717_v48  ;;  %v695_v36 = vpop.f32.mrf.mxu1 }
 0x12b   : > { %v696_v50 = vadd.f32 %v1331_v15, %v695_v36  ;;  %v687_v51 = vpop.f32.mrf.mxu0 }
 0x12c   : > { %v738_v52 = vmax.f32 %v718_v49, 0.0  ;;  %v688_v53 = vadd.f32 %v1331_v15, %v687_v51 }
 0x12d   : > { %v729_v54 = vmax.f32 %v696_v50, 0.0 }
 0x12e   : > { %v754_v55 = vpack.c.bf16 %v738_v52, %v738_v52  ;;  %v726_v56 = vmax.f32 %v688_v53, 0.0 }
 0x12f   : > { %v745_v57 = vpack.c.bf16 %v729_v54, %v729_v54 }
 0x130   : > { %771 = vst.msk [vmem:[%s1337_s13 + $0x34] sm:$0xf] %vm757_vm5, %v754_v55  ;;  %v742_v58 = vpack.c.bf16 %v726_v56, %v726_v56 }
 0x131   : > { %762 = vst.msk [vmem:[%s1337_s13 + $0x10] sm:$0xf] %vm757_vm5, %v745_v57 }
 0x132   : > { %759 = vst.msk [vmem:[%s1337_s13 + $0x4] sm:$0xf] %vm757_vm5, %v742_v58  ;;  %v697_v59 = vpop.f32.mrf.mxu1 }
 0x133   : > { %v698_v1 = vadd.f32 %v1331_v15, %v697_v59 }
 0x135   : > { %v730_v60 = vmax.f32 %v698_v1, 0.0 }
 0x137   : > { %v746_v61 = vpack.c.bf16 %v730_v60, %v730_v60 }
 0x139   : > { %763 = vst.msk [vmem:[%s1337_s13 + $0x14] sm:$0xf] %vm757_vm5, %v746_v61  ;;  %v710_v62 = vpop.f32.mrf.mxu2 }
 0x13a   : > { %v711_v63 = vadd.f32 %v1331_v15, %v710_v62 }
 0x13c   : > { %v735_v2 = vmax.f32 %v711_v63, 0.0 }
 0x13e   : > { %v751_v4 = vpack.c.bf16 %v735_v2, %v735_v2 }
 0x140   : > { %768 = vst.msk [vmem:[%s1337_s13 + $0x28] sm:$0xf] %vm757_vm5, %v751_v4  ;;  %v720_v3 = vpop.f32.mrf.mxu3 }
 0x141   : > { %v721_v5 = vadd.f32 %v1331_v15, %v720_v3  ;;  %v712_v6 = vpop.f32.mrf.mxu2 }
 0x142   : > { %v713_v7 = vadd.f32 %v1331_v15, %v712_v6 }
 0x143   : > { %v739_v8 = vmax.f32 %v721_v5, 0.0  ;;  %v690_v10 = vpop.f32.mrf.mxu0 }
 0x144   : > { %v736_v28 = vmax.f32 %v713_v7, 0.0  ;;  %v691_v11 = vadd.f32 %v1331_v15, %v690_v10 }
 0x145   : > { %v755_v12 = vpack.c.bf16 %v739_v8, %v739_v8 }
 0x146   : > { %v752_v13 = vpack.c.bf16 %v736_v28, %v736_v28  ;;  %v727_v16 = vmax.f32 %v691_v11, 0.0 }
 0x147   : > { %772 = vst.msk [vmem:[%s1337_s13 + $0x38] sm:$0xf] %vm757_vm5, %v755_v12 }
 0x148   : > { %769 = vst.msk [vmem:[%s1337_s13 + $0x2c] sm:$0xf] %vm757_vm5, %v752_v13  ;;  %v743_v9 = vpack.c.bf16 %v727_v16, %v727_v16  ;;  %v722_v17 = vpop.f32.mrf.mxu3 }
 0x149   : > { %v723_v18 = vadd.f32 %v1331_v15, %v722_v17 }
 0x14a   : > { %760 = vst.msk [vmem:[%s1337_s13 + $0x8] sm:$0xf] %vm757_vm5, %v743_v9  ;;  %v700_v19 = vpop.f32.mrf.mxu1 }
 0x14b   : > { %v740_v20 = vmax.f32 %v723_v18, 0.0  ;;  %v701_v0 = vadd.f32 %v1331_v15, %v700_v19  ;;  %v692_v21 = vpop.f32.mrf.mxu0 }
 0x14c   : > { %v693_v22 = vadd.f32 %v1331_v15, %v692_v21 }
 0x14d   : > { %v756_v23 = vpack.c.bf16 %v740_v20, %v740_v20  ;;  %v731_v24 = vmax.f32 %v701_v0, 0.0 }
 0x14e   : > { %v728_v26 = vmax.f32 %v693_v22, 0.0 }
 0x14f   : > { %773 = vst.msk [vmem:[%s1337_s13 + $0x3c] sm:$0xf] %vm757_vm5, %v756_v23  ;;  %v747_v25 = vpack.c.bf16 %v731_v24, %v731_v24 }
 0x150   : > { %v744_v27 = vpack.c.bf16 %v728_v26, %v728_v26 }
 0x151   : > { %764 = vst.msk [vmem:[%s1337_s13 + $0x18] sm:$0xf] %vm757_vm5, %v747_v25 }
 0x152   : > { %761 = vst.msk [vmem:[%s1337_s13 + $0xc] sm:$0xf] %vm757_vm5, %v744_v27  ;;  %v702_v29 = vpop.f32.mrf.mxu1 }
 0x153   : > { %v703_v30 = vadd.f32 %v1331_v15, %v702_v29 }
 0x155   : > { %v732_v31 = vmax.f32 %v703_v30, 0.0 }
 0x157   : > { %v748_v32 = vpack.c.bf16 %v732_v31, %v732_v31 }
 0x159   : > { %765 = vst.msk [vmem:[%s1337_s13 + $0x1c] sm:$0xf] %vm757_vm5, %v748_v32 }
 0x15a PF: > { %s14_s19 = sadd.s32 1, %s1087_s19   ;;  %s1407_s15 = smov %s1079_s17 }
 0x15b   : > { %p11_p9 = scmp.ge.s32.totalorder %s14_s19, 6   ;;  %s1408_s16 = smov %s1083_s18 }
 0x15c   : > { %s1409_s17 = smov %s1412_s20  ;;  %s1410_s18 = smov %s1416_s21 }
 0x15d   :  { %13 = sbr.rel (!%p11_p9) target bundleno = 3 (0x3), region = 69 }

// kernel: _lambda_.5
= control target key start
LH: loop header
LB: loop body
LE: loop exit
PB: predicated region body
PF: predicated region fallthrough
CT: control target
= control target key end

     0   :  { %s1079_s15 = smov 0   ;;  %s1081_s16 = smov 0   ;;  %s1240_s0 = inlined_call_operand.vmem [shape: bf16[2,9,9,64], index: 0, kind: input, shape index: {}, may-alias: {0,1}]   ;;  %s1241_s1 = inlined_call_operand.vmem [shape: bf16[2,9,9,64], index: 1, kind: input, shape index: {}, may-alias: {0,1}]   ;;  %s1242_s2 = inlined_call_operand.vmem [shape: bf16[256,32], index: 2, kind: input, shape index: {}]   ;;  %s1243_s3 = inlined_call_operand.vmem [shape: f32[1,32], index: 3, kind: input, shape index: {}]   ;;  %s1244_s4 = inlined_call_operand.vmem [shape: bf16[2,8,8,32], index: 4, kind: output, shape index: {}]  }
   0x1   :  { %s1083_s17 = smov 0  }
   0x2 LB: > { %s26_s18 = sadd.s32 1, %s1047_s16  ;;  %p849_p0 = scmp.ge.s32.totalorder %s1051_s17, 1  ;;  %s1051_s17 = sphi %s1083_s17, %s14_s17   ;;  %s1047_s16 = sphi %s1081_s16, %s1246_s16   ;;  %s1043_s15 = sphi %s1079_s15, %s1245_s15  }
   0x3   : > { %p28_p1 = scmp.ge.s32.totalorder %s26_s18, 2  ;;  %p218_p2 = scmp.lt.s32.totalorder %s1051_s17, 3 }
   0x5   : > { %s1248_s18 = smov (%p28_p1, %s26_s18), 0  ;;  %p219_p3 = pnand %p849_p0, %p218_p2 }
   0x6   : > { %p275_p4 = scmp.lt.s32.totalorder (!%p219_p3), %s1043_s15, 1  ;;  %s1053_s11 = smov (!%p219_p3), 64  }
   0x7   : > { %222 = sbr.rel (%p219_p3) target bundleno = 319 (0x13f), region = 36 }
   0xc   : > { %v983_v0 = vld [vmem:[%s1242_s2 + $0x78] sm:$0xff]  ;;  %s1250_s15 = smov (!%p275_p4, %s1043_s15), 1  ;;  %v982_v1 = vld [vmem:[%s1242_s2 + $0x70] sm:$0xff]  ;;  %v981_v2 = vld [vmem:[%s1242_s2 + $0x68] sm:$0xff]  ;;  %vm457_vm0 = vcmask 523264   ;;  %vm725_vm1 = vcmask 257024  }
   0xd   : > { %680 = vmatpush.bf16.msra.mxu1 %v983_v0  ;;  %992 = vmatpush.bf16.msra.mxu3 %v983_v0  ;;  %s1000_s23 = smul.u32 72, %s1250_s15  ;;  %v980_v15 = vld [vmem:[%s1242_s2 + $0x60] sm:$0xff]  ;;  %v979_v38 = vld [vmem:[%s1242_s2 + $0x58] sm:$0xff] }
   0xf   : > { %s1109_s26 = scalar_lea.vmem %s1240_s0, %s1000_s23  ;;  %s1111_s27 = sadd.s32 64, %s1000_s23 }
  0x10   : > { %v880_v3 = vld [vmem:[%s1109_s26 + $0x30] sm:$0xf]  ;;  %v965_v4 = vld [vmem:[%s1109_s26 + $0x30] sm:$0x10]  ;;  %v872_v5 = vld [vmem:[%s1109_s26 + $0x20] sm:$0xf]  ;;  %s1135_s8 = scalar_lea.vmem %s1241_s1, %s1111_s27 }
  0x11   : > { %681 = vmatpush.bf16.msra.mxu1 %v982_v1  ;;  %993 = vmatpush.bf16.msra.mxu3 %v982_v1  ;;  %v881_v6 = vor.u32 %v965_v4, %v880_v3  ;;  %v963_v7 = vld [vmem:[%s1109_s26 + $0x20] sm:$0x10]  ;;  %v860_v8 = vld [vmem:[%s1109_s26 + $0x8] sm:$0xf]  ;;  %v960_v9 = vld [vmem:[%s1109_s26 + $0x8] sm:$0x10] }
  0x12   : > { %v873_v10 = vor.u32 %v963_v7, %v872_v5  ;;  %v861_v11 = vor.u32 %v960_v9, %v860_v8  ;;  %v876_v12 = vld [vmem:[%s1109_s26 + $0x28] sm:$0xf]  ;;  %v964_v13 = vld [vmem:[%s1109_s26 + $0x28] sm:$0x10]  ;;  %v864_v14 = vld [vmem:[%s1109_s26 + $0x10] sm:$0xf] }
  0x13   : > { %v414_v16 = vshrl.u32 %v881_v6, 16  ;;  %v416_v17 = vshll.u32 %v881_v6, 16  ;;  %v877_v18 = vor.u32 %v964_v13, %v876_v12  ;;  %v961_v19 = vld [vmem:[%s1109_s26 + $0x10] sm:$0x10]  ;;  %v856_v20 = vld [vmem:[%s1109_s26] sm:$0xf] }
  0x14   : > { %v400_v21 = vshrl.u32 %v873_v10, 16  ;;  %v402_v22 = vshll.u32 %v873_v10, 16  ;;  %v379_v23 = vshrl.u32 %v861_v11, 16  ;;  %v381_v24 = vshll.u32 %v861_v11, 16  ;;  %v959_v25 = vld [vmem:[%s1109_s26] sm:$0x10] }
  0x15   : > { %682 = vmatpush.bf16.msra.mxu1 %v981_v2  ;;  %994 = vmatpush.bf16.msra.mxu3 %v981_v2  ;;  %v418_v26 = vrot.slane %v416_v17, 1  ;;  %v409_v27 = vshll.u32 %v877_v18, 16  ;;  %v865_v28 = vor.u32 %v961_v19, %v864_v14  ;;  %v857_v31 = vor.u32 %v959_v25, %v856_v20  ;;  %v884_v32 = vld [vmem:[%s1109_s26 + $0x38] sm:$0xf]  ;;  %v966_v33 = vld [vmem:[%s1109_s26 + $0x38] sm:$0x10] }
  0x16   : > { %v404_v29 = vrot.slane %v402_v22, 1  ;;  %v383_v30 = vrot.slane %v381_v24, 1  ;;  %v868_v36 = vld [vmem:[%s1109_s26 + $0x18] sm:$0xf]  ;;  %v962_v37 = vld [vmem:[%s1109_s26 + $0x18] sm:$0x10]  ;;  %v885_v50 = vor.u32 %v966_v33, %v884_v32 }
  0x17   : > { %v419_v34 = vor.u32 %v418_v26, %v414_v16  ;;  %v388_v35 = vshll.u32 %v865_v28, 16  ;;  %v407_v41 = vshrl.u32 %v877_v18, 16  ;;  %v374_v42 = vshll.u32 %v857_v31, 16  ;;  %v888_v43 = vld [vmem:[%s1135_s8] sm:$0xf]  ;;  %v978_v4 = vld [vmem:[%s1242_s2 + $0x50] sm:$0xff] }
  0x18   : > { %v405_v39 = vor.u32 %v404_v29, %v400_v21  ;;  %v384_v40 = vor.u32 %v383_v30, %v379_v23  ;;  %v967_v44 = vld [vmem:[%s1135_s8] sm:$0x10]  ;;  %v411_v45 = vrot.slane %v409_v27, 1  ;;  %v386_v46 = vshrl.u32 %v865_v28, 16  ;;  %v975_v5 = vld [vmem:[%s1242_s2 + $0x38] sm:$0xff]  ;;  %v977_v6 = vld [vmem:[%s1242_s2 + $0x48] sm:$0xff] }
  0x19   : > { %683 = vmatpush.bf16.msra.mxu1 %v980_v15  ;;  %995 = vmatpush.bf16.msra.mxu3 %v980_v15  ;;  %v390_v47 = vrot.slane %v388_v35, 1  ;;  %v372_v48 = vshrl.u32 %v857_v31, 16  ;;  %v376_v49 = vrot.slane %v374_v42, 1  ;;  %v869_v51 = vor.u32 %v962_v37, %v868_v36  ;;  %v974_v7 = vld [vmem:[%s1242_s2 + $0x30] sm:$0xff]  ;;  %v976_v8 = vld [vmem:[%s1242_s2 + $0x40] sm:$0xff]  ;;  %v973_v9 = vld [vmem:[%s1242_s2 + $0x28] sm:$0xff] }
  0x1a   : > { %439 = vrot.lane.b32.xlu1 %v419_v34, %s1053_s11  ;;  %435 = vrot.lane.b32.xlu0 %v405_v39, %s1053_s11  ;;  %v889_v52 = vor.u32 %v967_v44, %v888_v43  ;;  %v412_v55 = vor.u32 %v411_v45, %v407_v41  ;;  %v423_v57 = vshll.u32 %v885_v50, 16  ;;  %v421_v61 = vshrl.u32 %v885_v50, 16  ;;  %v972_v10 = vld [vmem:[%s1242_s2 + $0x20] sm:$0xff]  ;;  %v971_v11 = vld [vmem:[%s1242_s2 + $0x18] sm:$0xff] }
  0x1b   : > { %429 = vrot.lane.b32.xlu2 %v384_v40, %s1053_s11  ;;  %v377_v53 = vor.u32 %v376_v49, %v372_v48  ;;  %v391_v56 = vor.u32 %v390_v47, %v386_v46  ;;  %v395_v58 = vshll.u32 %v869_v51, 16  ;;  %v393_v63 = vshrl.u32 %v869_v51, 16  ;;  %651 = vmatpush.bf16.msra.mxu0 %v975_v5  ;;  %v970_v12 = vld [vmem:[%s1242_s2 + $0x10] sm:$0xff]  ;;  %v969_v13 = vld [vmem:[%s1242_s2 + $0x8] sm:$0xff]  ;;  %v968_v15 = vld [vmem:[%s1242_s2] sm:$0xff] }
  0x1c   : > { %v451_v54 = vshll.u32 %v889_v52, 16  ;;  %v449_v59 = vshrl.u32 %v889_v52, 16  ;;  %v425_v62 = vrot.slane %v423_v57, 1  ;;  %984 = vmatpush.bf16.msra.mxu2 %v975_v5  ;;  %v315_v16 = vld [vmem:[%s1109_s26 + $0x8] sm:$0xf] }
  0x1d   : > { %684 = vmatpush.bf16.msra.mxu1 %v979_v38  ;;  %996 = vmatpush.bf16.msra.mxu3 %v979_v38  ;;  %v397_v0 = vrot.slane %v395_v58, 1  ;;  %v317_v18 = vld [vmem:[%s1109_s26 + $0x10] sm:$0xf]  ;;  %v319_v24 = vld [vmem:[%s1109_s26 + $0x18] sm:$0xf] }
  0x1e   : > { %v453_v60 = vrot.slane %v451_v54, 1  ;;  %v426_v2 = vor.u32 %v425_v62, %v421_v61  ;;  %v321_v27 = vld [vmem:[%s1109_s26 + $0x20] sm:$0xf]  ;;  %v325_v33 = vld [vmem:[%s1109_s26 + $0x30] sm:$0xf] }
  0x1f   : > { %v398_v3 = vor.u32 %v397_v0, %v393_v63  ;;  %652 = vmatpush.bf16.msra.mxu0 %v974_v7  ;;  %v313_v35 = vld [vmem:[%s1109_s26] sm:$0xf]  ;;  %v323_v36 = vld [vmem:[%s1109_s26 + $0x28] sm:$0xf]  ;;  %v327_v50 = vld [vmem:[%s1109_s26 + $0x38] sm:$0xf] }
  0x20   : > { %v454_v1 = vor.u32 %v453_v60, %v449_v59  ;;  %985 = vmatpush.bf16.msra.mxu2 %v974_v7  ;;  %v329_v48 = vld [vmem:[%s1135_s8] sm:$0xf]  ;;  %s958_s26 = sshll.u32 %s1250_s15, 5 }
  0x21   : > { %685 = vmatpush.bf16.msra.mxu1 %v978_v4  ;;  %997 = vmatpush.bf16.msra.mxu3 %v978_v4  ;;  %v1028_v60 = vld [vmem:[%s1243_s3] ss:$0 sm:$0xff]  ;;  %s1213_s21 = scalar_lea.vmem %s1244_s4, %s958_s26 }
  0x22   : > { %427 = vrot.lane.b32.xlu1 %v377_v53, %s1053_s11  ;;  %437 = vrot.lane.b32.xlu0 %v412_v55, %s1053_s11 }
  0x23   : > { %431 = vrot.lane.b32.xlu2 %v391_v56, %s1053_s11  ;;  %653 = vmatpush.bf16.msra.mxu0 %v973_v9 }
  0x24   : > { %986 = vmatpush.bf16.msra.mxu2 %v973_v9 }
  0x25   : > { %686 = vmatpush.bf16.msra.mxu1 %v977_v6  ;;  %998 = vmatpush.bf16.msra.mxu3 %v977_v6 }
  0x27   : > { %654 = vmatpush.bf16.msra.mxu0 %v972_v10 }
  0x28   : > { %987 = vmatpush.bf16.msra.mxu2 %v972_v10 }
  0x29   : > { %687 = vmatpush.bf16.msra.mxu1 %v976_v8  ;;  %999 = vmatpush.bf16.msra.mxu3 %v976_v8 }
  0x2a   : > { %455 = vrot.lane.b32.xlu1 %v454_v1, %s1053_s11  ;;  %441 = vrot.lane.b32.xlu0 %v426_v2, %s1053_s11 }
  0x2b   : > { %433 = vrot.lane.b32.xlu2 %v398_v3, %s1053_s11  ;;  %655 = vmatpush.bf16.msra.mxu0 %v971_v11 }
  0x2c   : > { %988 = vmatpush.bf16.msra.mxu2 %v971_v11 }
  0x2f   : > { %656 = vmatpush.bf16.msra.mxu0 %v970_v12 }
  0x30   : > { %989 = vmatpush.bf16.msra.mxu2 %v970_v12 }
  0x33   : > { %657 = vmatpush.bf16.msra.mxu0 %v969_v13 }
  0x34   : > { %990 = vmatpush.bf16.msra.mxu2 %v969_v13 }
  0x37   : > { %658 = vmatpush.bf16.msra.mxu0 %v968_v15 }
  0x38   : > { %991 = vmatpush.bf16.msra.mxu2 %v968_v15 }
  0x75   : > { %v430_v14 = vpop.permute.xlu2 %429 }
  0x76   : > { %v463_v17 = vsel %vm457_vm0, %v315_v16, %v430_v14 }
  0x77   : > { %v495_v19 = vunpack.c.l.b16 %v463_v17 }
  0x7d   : > { %v432_v20 = vpop.permute.xlu2 %431 }
  0x7e   : > { %v466_v21 = vsel %vm457_vm0, %v317_v18, %v432_v20 }
  0x7f   : > { %v496_v22 = vunpack.c.l.b16 %v466_v21 }
  0x81   : > { %v540_v23 = vpack.c.b16 %v496_v22, %v495_v19 }
  0x83   : > { %688 = vmatmul.bf16.vlgmr.msra.gmra.mxu1 %v540_v23 }
  0x85   : > { %v434_v25 = vpop.permute.xlu2 %433 }
  0x86   : > { %v469_v26 = vsel %vm457_vm0, %v319_v24, %v434_v25 }
  0x87   : > { %v497_v30 = vunpack.c.l.b16 %v469_v26 }
  0x89   : > { %v541_v57 = vpack.c.b16 %v497_v30, %v496_v22 }
  0x8c   : > { %v440_v28 = vpop.permute.xlu1 %439  ;;  %v436_v29 = vpop.permute.xlu0 %435 }
  0x8d   : > { %v472_v31 = vsel %vm457_vm0, %v321_v27, %v436_v29  ;;  %v478_v37 = vsel %vm457_vm0, %v325_v33, %v440_v28 }
  0x8e   : > { %v498_v32 = vunpack.c.l.b16 %v472_v31  ;;  %v500_v43 = vunpack.c.l.b16 %v478_v37 }
  0x90   : > { %v542_v34 = vpack.c.b16 %v498_v32, %v497_v30 }
  0x93   : > { %693 = vmatmul.bf16.gmra.mxu1 %v542_v34 }
  0x94   : > { %v428_v38 = vpop.permute.xlu1 %427  ;;  %v438_v39 = vpop.permute.xlu0 %437 }
  0x95   : > { %v460_v40 = vsel %vm457_vm0, %v313_v35, %v428_v38  ;;  %v475_v41 = vsel %vm457_vm0, %v323_v36, %v438_v39 }
  0x96   : > { %v494_v42 = vunpack.c.l.b16 %v460_v40  ;;  %v499_v44 = vunpack.c.l.b16 %v475_v41 }
  0x98   : > { %v539_v45 = vpack.c.b16 %v495_v19, %v494_v42  ;;  %v543_v46 = vpack.c.b16 %v499_v44, %v498_v32  ;;  %v544_v47 = vpack.c.b16 %v500_v43, %v499_v44 }
  0x9a   : > { %659 = vmatmul.bf16.vlgmr.msra.gmra.mxu0 %v539_v45  ;;  %669 = vmatmul.bf16.vlgmr.msra.gmra.mxu2 %v543_v46 }
  0x9b   : > { %698 = vmatmul.bf16.vlgmr.msra.gmra.mxu3 %v544_v47 }
  0x9c   : > { %v456_v49 = vpop.permute.xlu1 %455  ;;  %v442_v51 = vpop.permute.xlu0 %441 }
  0x9d   : > { %v484_v52 = vsel %vm457_vm0, %v329_v48, %v456_v49  ;;  %v481_v53 = vsel %vm457_vm0, %v327_v50, %v442_v51 }
  0x9e   : > { %v502_v54 = vunpack.c.l.b16 %v484_v52  ;;  %v501_v55 = vunpack.c.l.b16 %v481_v53 }
  0xa0   : > { %v546_v56 = vpack.c.b16 %v502_v54, %v501_v55  ;;  %v545_v58 = vpack.c.b16 %v501_v55, %v500_v43 }
  0xaa   : > { %664 = vmatmul.bf16.gmra.mxu0 %v541_v57  ;;  %674 = vmatmul.bf16.gmra.mxu2 %v545_v58 }
  0xab   : > { %703 = vmatmul.bf16.gmra.mxu3 %v546_v56 }
 0x100   : > { %v689_v59 = vpop.f32.mrf.mxu1 }
 0x108   : > { %v691_v1 = vpop.f32.mrf.mxu1 }
 0x110   : > { %v694_v16 = vpop.f32.mrf.mxu1 }
 0x117   : > { %v660_v61 = vpop.f32.mrf.mxu0 }
 0x118   : > { %v661_v62 = vadd.f32 %v1028_v60, %v660_v61  ;;  %v696_v31 = vpop.f32.mrf.mxu1 }
 0x11a   : > { %v690_v63 = vadd.f32 %v689_v59, %v661_v62 }
 0x11c   : > { %v709_v0 = vmax.f32 %v690_v63, 0.0 }
 0x11d   : > { %v670_v3 = vpop.f32.mrf.mxu2 }
 0x11e   : > { %v717_v2 = vpack.c.bf16 %v709_v0, %v709_v0  ;;  %v699_v4 = vpop.f32.mrf.mxu3  ;;  %v671_v5 = vadd.f32 %v1028_v60, %v670_v3 }
 0x11f   : > { %v662_v6 = vpop.f32.mrf.mxu0 }
 0x120   : > { %726 = vst.msk [vmem:[%s1213_s21] sm:$0xf] %vm725_vm1, %v717_v2  ;;  %v663_v7 = vadd.f32 %v1028_v60, %v662_v6  ;;  %v700_v8 = vadd.f32 %v699_v4, %v671_v5 }
 0x122   : > { %v692_v9 = vadd.f32 %v691_v1, %v663_v7  ;;  %v713_v10 = vmax.f32 %v700_v8, 0.0 }
 0x124   : > { %v710_v11 = vmax.f32 %v692_v9, 0.0  ;;  %v721_v12 = vpack.c.bf16 %v713_v10, %v713_v10 }
 0x125   : > { %v672_v14 = vpop.f32.mrf.mxu2 }
 0x126   : > { %v718_v13 = vpack.c.bf16 %v710_v11, %v710_v11  ;;  %v701_v15 = vpop.f32.mrf.mxu3  ;;  %730 = vst.msk [vmem:[%s1213_s21 + $0x10] sm:$0xf] %vm725_vm1, %v721_v12  ;;  %v673_v17 = vadd.f32 %v1028_v60, %v672_v14 }
 0x127   : > { %v665_v18 = vpop.f32.mrf.mxu0 }
 0x128   : > { %727 = vst.msk [vmem:[%s1213_s21 + $0x4] sm:$0xf] %vm725_vm1, %v718_v13  ;;  %v666_v19 = vadd.f32 %v1028_v60, %v665_v18  ;;  %v702_v20 = vadd.f32 %v701_v15, %v673_v17 }
 0x12a   : > { %v695_v21 = vadd.f32 %v694_v16, %v666_v19  ;;  %v714_v22 = vmax.f32 %v702_v20, 0.0 }
 0x12c   : > { %v711_v23 = vmax.f32 %v695_v21, 0.0  ;;  %v722_v24 = vpack.c.bf16 %v714_v22, %v714_v22 }
 0x12d   : > { %v675_v26 = vpop.f32.mrf.mxu2 }
 0x12e   : > { %v719_v25 = vpack.c.bf16 %v711_v23, %v711_v23  ;;  %v704_v27 = vpop.f32.mrf.mxu3  ;;  %731 = vst.msk [vmem:[%s1213_s21 + $0x14] sm:$0xf] %vm725_vm1, %v722_v24  ;;  %v676_v28 = vadd.f32 %v1028_v60, %v675_v26 }
 0x12f   : > { %v667_v29 = vpop.f32.mrf.mxu0 }
 0x130   : > { %728 = vst.msk [vmem:[%s1213_s21 + $0x8] sm:$0xf] %vm725_vm1, %v719_v25  ;;  %v668_v30 = vadd.f32 %v1028_v60, %v667_v29  ;;  %v705_v32 = vadd.f32 %v704_v27, %v676_v28 }
 0x132   : > { %v697_v33 = vadd.f32 %v696_v31, %v668_v30  ;;  %v715_v34 = vmax.f32 %v705_v32, 0.0 }
 0x134   : > { %v712_v35 = vmax.f32 %v697_v33, 0.0  ;;  %v723_v36 = vpack.c.bf16 %v715_v34, %v715_v34 }
 0x135   : > { %v677_v38 = vpop.f32.mrf.mxu2 }
 0x136   : > { %v720_v37 = vpack.c.bf16 %v712_v35, %v712_v35  ;;  %732 = vst.msk [vmem:[%s1213_s21 + $0x18] sm:$0xf] %vm725_vm1, %v723_v36  ;;  %v678_v39 = vadd.f32 %v1028_v60, %v677_v38  ;;  %v706_v40 = vpop.f32.mrf.mxu3 }
 0x138   : > { %729 = vst.msk [vmem:[%s1213_s21 + $0xc] sm:$0xf] %vm725_vm1, %v720_v37  ;;  %v707_v41 = vadd.f32 %v706_v40, %v678_v39 }
 0x13a   : > { %v716_v42 = vmax.f32 %v707_v41, 0.0 }
 0x13c   : > { %v724_v43 = vpack.c.bf16 %v716_v42, %v716_v42 }
 0x13e   : > { %733 = vst.msk [vmem:[%s1213_s21 + $0x1c] sm:$0xf] %vm725_vm1, %v724_v43 }
 0x13f PF: > { %s14_s17 = sadd.s32 1, %s1051_s17   ;;  %s1245_s15 = smov %s1047_s16 }
 0x140   : > { %p11_p5 = scmp.ge.s32.totalorder %s14_s17, 4   ;;  %s1246_s16 = smov %s1248_s18 }
 0x142   :  { %13 = sbr.rel (!%p11_p5) target bundleno = 2 (0x2), region = 69 }

// kernel: _lambda_.6
= control target key start
LH: loop header
LB: loop body
LE: loop exit
PB: predicated region body
PF: predicated region fallthrough
CT: control target
= control target key end

     0   :  { %vm97_vm0 = vcmask 261120   ;;  %v313_v62 = vmov 0   ;;  %s421_s1 = inlined_call_operand.vmem [shape: bf16[32,32], index: 1, kind: input, shape index: {}]   ;;  %s422_s2 = inlined_call_operand.vmem [shape: f32[1,32], index: 2, kind: input, shape index: {}]   ;;  %s423_s0 = inlined_call_operand.vmem [shape: bf16[128,32], index: 0, kind: input, shape index: {}]   ;;  %s424_s4 = inlined_call_operand.vmem [shape: f32[8,1], index: 4, kind: input, shape index: {}]   ;;  %s425_s3 = inlined_call_operand.vmem [shape: bf16[8,32], index: 3, kind: input, shape index: {}]   ;;  %s426_s5 = inlined_call_operand.vmem [shape: f32[8,128], index: 5, kind: output, shape index: {}]  }
   0x1   :  { %v305_v0 = vld [vmem:[%s421_s1 + $0x8] sm:$0xff]  ;;  %v304_v1 = vld [vmem:[%s421_s1] sm:$0xff]  ;;  %v299_v5 = vld [vmem:[%s423_s0 + $0x18] sm:$0xff]  ;;  %311 = vset.pattern.permute.xlu0 %v313_v62 }
   0x2   :  { %307 = vmatpush.bf16.msra.mxu3 %v305_v0  ;;  %128 = vmatpush.bf16.msra.mxu0 %v305_v0  ;;  %v300_v2 = vld [vmem:[%s423_s0 + $0x20] sm:$0xff]  ;;  %v301_v3 = vld [vmem:[%s423_s0 + $0x28] sm:$0xff]  ;;  %v302_v6 = vld [vmem:[%s423_s0 + $0x30] sm:$0xff] }
   0x3   :  { %306 = vmatpush.bf16.msra.mxu2 %v305_v0  ;;  %v296_v4 = vld [vmem:[%s423_s0] sm:$0xff]  ;;  %v297_v7 = vld [vmem:[%s423_s0 + $0x8] sm:$0xff]  ;;  %v303_v8 = vld [vmem:[%s423_s0 + $0x38] sm:$0xff] }
   0x4   :  { %v298_v9 = vld [vmem:[%s423_s0 + $0x10] sm:$0xff]  ;;  %v385_v10 = vld [vmem:[%s422_s2] ss:$0 sm:$0xff] }
   0x5   :  { %v196_v61 = vld [vmem:[%s424_s4] sm:$0xff] }
   0x6   :  { %309 = vmatpush.bf16.msra.mxu3 %v304_v1  ;;  %129 = vmatpush.bf16.msra.mxu0 %v304_v1 }
   0x7   :  { %308 = vmatpush.bf16.msra.mxu2 %v304_v1  ;;  %199 = vperm.xlu0 %311, %v196_v61  }
   0x9   :  { %291 = vmatmul.msk.bf16.vlgmr.msra.gmra.mxu3 %vm97_vm0, %v300_v2  ;;  %287 = vmatmul.msk.bf16.vlgmr.msra.gmra.mxu0 %vm97_vm0, %v296_v4 }
   0xa   :  { %290 = vmatmul.msk.bf16.vlgmr.msra.gmra.mxu2 %vm97_vm0, %v299_v5 }
  0x19   :  { %292 = vmatmul.msk.bf16.gmra.mxu3 %vm97_vm0, %v301_v3  ;;  %288 = vmatmul.msk.bf16.gmra.mxu0 %vm97_vm0, %v297_v7 }
  0x29   :  { %293 = vmatmul.msk.bf16.gmra.mxu3 %vm97_vm0, %v302_v6  ;;  %289 = vmatmul.msk.bf16.gmra.mxu0 %vm97_vm0, %v298_v9 }
  0x39   :  { %294 = vmatmul.msk.bf16.gmra.mxu3 %vm97_vm0, %v303_v8 }
  0x86   :  { %v131_v21 = vpop.f32.mrf.mxu0 }
  0x87   :  { %v132_v5 = vadd.f32 %v385_v10, %v131_v21 }
  0x89   :  { %v171_v8 = vmax.f32 %v132_v5, 0.0 }
  0x8c   :  { %v151_v11 = vpop.f32.mrf.mxu3 }
  0x8d   :  { %v152_v12 = vadd.f32 %v385_v10, %v151_v11  ;;  %v146_v41 = vpop.f32.mrf.mxu2 }
  0x8e   :  { %v133_v24 = vpop.f32.mrf.mxu0  ;;  %v147_v49 = vadd.f32 %v385_v10, %v146_v41 }
  0x8f   :  { %v179_v15 = vmax.f32 %v152_v12, 0.0  ;;  %v134_v6 = vadd.f32 %v385_v10, %v133_v24 }
  0x90   :  { %v177_v51 = vmax.f32 %v147_v49, 0.0 }
  0x91   :  { %v172_v9 = vmax.f32 %v134_v6, 0.0 }
  0x93   :  { %v188_v12 = vpack.c.bf16 %v172_v9, %v171_v8 }
  0x94   :  { %v153_v13 = vpop.f32.mrf.mxu3 }
  0x95   :  { %v154_v14 = vadd.f32 %v385_v10, %v153_v13  ;;  %v148_v48 = vpop.f32.mrf.mxu2  ;;  %v206_v13 = vsel %vm97_vm0, %v188_v12, 0 }
  0x96   :  { %v136_v28 = vpop.f32.mrf.mxu0  ;;  %v149_v50 = vadd.f32 %v385_v10, %v148_v48 }
  0x97   :  { %v180_v16 = vmax.f32 %v154_v14, 0.0  ;;  %v137_v63 = vadd.f32 %v385_v10, %v136_v28  ;;  %v187_v14 = vld [vmem:[%s425_s3] sm:$0xf] }
  0x98   :  { %v178_v52 = vmax.f32 %v149_v50, 0.0 }
  0x99   :  { %v192_v17 = vpack.c.bf16 %v180_v16, %v179_v15  ;;  %v173_v2 = vmax.f32 %v137_v63, 0.0  ;;  %v200_v15 = vpop.permute.xlu0 %199 }
  0x9a   :  { %v191_v57 = vpack.c.bf16 %v178_v52, %v177_v51 }
  0x9b   :  { %v218_v53 = vsel %vm97_vm0, %v192_v17, 0 }
  0x9c   :  { %v156_v18 = vpop.f32.mrf.mxu3  ;;  %v215_v60 = vsel %vm97_vm0, %v191_v57, 0 }
  0x9d   :  { %v157_v40 = vadd.f32 %v385_v10, %v156_v18 }
  0x9e   :  { %v138_v39 = vpop.f32.mrf.mxu0 }
  0x9f   :  { %v181_v44 = vmax.f32 %v157_v40, 0.0  ;;  %v139_v0 = vadd.f32 %v385_v10, %v138_v39 }
  0xa1   :  { %v174_v3 = vmax.f32 %v139_v0, 0.0 }
  0xa3   :  { %v189_v7 = vpack.c.bf16 %v174_v3, %v173_v2 }
  0xa4   :  { %v158_v19 = vpop.f32.mrf.mxu3 }
  0xa5   :  { %v159_v37 = vadd.f32 %v385_v10, %v158_v19  ;;  %v209_v11 = vsel %vm97_vm0, %v189_v7, 0 }
  0xa6   :  { %v141_v46 = vpop.f32.mrf.mxu0 }
  0xa7   :  { %v182_v42 = vmax.f32 %v159_v37, 0.0  ;;  %v142_v55 = vadd.f32 %v385_v10, %v141_v46 }
  0xa9   :  { %v193_v45 = vpack.c.bf16 %v182_v42, %v181_v44  ;;  %v175_v58 = vmax.f32 %v142_v55, 0.0 }
  0xab   :  { %v221_v47 = vsel %vm97_vm0, %v193_v45, 0 }
  0xac   :  { %v161_v20 = vpop.f32.mrf.mxu3 }
  0xad   :  { %v162_v32 = vadd.f32 %v385_v10, %v161_v20 }
  0xae   :  { %v143_v54 = vpop.f32.mrf.mxu0 }
  0xaf   :  { %v183_v36 = vmax.f32 %v162_v32, 0.0  ;;  %v144_v56 = vadd.f32 %v385_v10, %v143_v54 }
  0xb1   :  { %v176_v59 = vmax.f32 %v144_v56, 0.0 }
  0xb3   :  { %v190_v1 = vpack.c.bf16 %v176_v59, %v175_v58 }
  0xb4   :  { %v163_v22 = vpop.f32.mrf.mxu3 }
  0xb5   :  { %v164_v29 = vadd.f32 %v385_v10, %v163_v22  ;;  %v212_v4 = vsel %vm97_vm0, %v190_v1, 0 }
  0xb7   :  { %v184_v34 = vmax.f32 %v164_v29, 0.0 }
  0xb9   :  { %v194_v38 = vpack.c.bf16 %v184_v34, %v183_v36 }
  0xbb   :  { %v224_v43 = vsel %vm97_vm0, %v194_v38, 0 }
  0xbc   :  { %v166_v23 = vpop.f32.mrf.mxu3 }
  0xbd   :  { %v167_v25 = vadd.f32 %v385_v10, %v166_v23 }
  0xbf   :  { %v185_v30 = vmax.f32 %v167_v25, 0.0 }
  0xc4   :  { %v168_v26 = vpop.f32.mrf.mxu3 }
  0xc5   :  { %v169_v27 = vadd.f32 %v385_v10, %v168_v26 }
  0xc7   :  { %v186_v31 = vmax.f32 %v169_v27, 0.0 }
  0xc9   :  { %v195_v33 = vpack.c.bf16 %v186_v31, %v185_v30 }
  0xcb   :  { %v227_v35 = vsel %vm97_vm0, %v195_v33, 0 }
  0xcc   :  { %229 = vmatpush.bf16.xpose.msra.mxu1 %v227_v35 }
  0xd4   :  { %230 = vmatpush.bf16.xpose.msra.mxu1 %v224_v43 }
  0xdc   :  { %231 = vmatpush.bf16.xpose.msra.mxu1 %v221_v47 }
  0xe4   :  { %232 = vmatpush.bf16.xpose.msra.mxu1 %v218_v53 }
  0xec   :  { %233 = vmatpush.bf16.xpose.msra.mxu1 %v215_v60 }
  0xf4   :  { %234 = vmatpush.bf16.xpose.msra.mxu1 %v212_v4 }
  0xfc   :  { %235 = vmatpush.bf16.xpose.msra.mxu1 %v209_v11 }
 0x104   :  { %236 = vmatpush.bf16.xpose.msra.mxu1 %v206_v13 }
 0x10b   :  { %295 = vmatmul.msk.bf16.vlgmr.msra.gmra.mxu1 %vm97_vm0, %v187_v14 }
 0x188   :  { %v238_v16 = vpop.f32.mrf.mxu1 }
 0x189   :  { %v239_v17 = vadd.f32 %v238_v16, %v200_v15 }
 0x18b   :  { %242 = vst [vmem:[%s426_s5] sm:$0xff] %v239_v17 }
 0x190   :  { %v240_v10 = vpop.f32.mrf.mxu1 }

// kernel: _lambda_.7
= control target key start
LH: loop header
LB: loop body
LE: loop exit
PB: predicated region body
PF: predicated region fallthrough
CT: control target
= control target key end

     0   :  { %s1315_s0 = inlined_call_operand.<no memory space> [shape: f32[1,1], index: 0, kind: input, shape index: {}]   ;;  %s1316_s1 = inlined_call_operand.vmem [shape: f32[8,2,8,8], index: 1, kind: input, shape index: {}]   ;;  %s1317_s2 = inlined_call_operand.vmem [shape: f32[16,8], index: 2, kind: input, shape index: {}]   ;;  %s1318_s3 = inlined_call_operand.vmem [shape: f32[8,16], index: 3, kind: input, shape index: {}]   ;;  %s1319_s4 = inlined_call_operand.hbm [shape: f32[2,16,16], index: 4, kind: output, shape index: {}]  }
   0x1   :  { %9 = sst [smem:[#allocation2]] %s1315_s0 }
   0x2   :  { %10 = vsyncpa [#allocation5], 0 }
   0x3   :  { %12 = vsyncpa [#allocation5 + $0x1], 0  ;;  %s1089_s17 = smov 0   ;;  %s1091_s18 = smov 0  }
   0x4   :  { %s1093_s19 = smov 0   ;;  %s1095_s20 = smov 0  }
   0x5 LB: > { %s871_s0 = sadd.s32 4294967295, %s1057_s20   ;;  %s872_s21 = sadd.s32 4294967294, %s1057_s20   ;;  %s1057_s20 = sphi %s1095_s20, %s1325_s20   ;;  %s1053_s19 = sphi %s1093_s19, %s1324_s19   ;;  %s1049_s18 = sphi %s1091_s18, %s1323_s18   ;;  %s1045_s17 = sphi %s1089_s17, %s1322_s17  }
   0x6   : > { %s1112_s22 = sadd.s32 1, %s1057_s20   ;;  %s46_s23 = sadd.s32 1, %s1053_s19 }
   0x7   : > { %s43_s24 = ssub.s32 %s1057_s20, %s1112_s22  ;;  %p53_p0 = scmp.ne.s32.totalorder %s1053_s19, %s1049_s18 }
   0x8   : > { %p44_p1 = scmp.eq.s32.totalorder %s43_s24, 0  ;;  %p54_p2 = scmp.eq.s32.totalorder %s1057_s20, 0 }
   0x9   : > { %p125_p3 = scmp.eq.s32.totalorder %s871_s0, 1  ;;  %p130_p4 = scmp.ne.s32.totalorder %s1049_s18, %s1045_s17 }
   0xa   : > { %s1125_s25 = scalar_select %p44_p1, %s1053_s19, %s46_s23  }
   0xb   : > { %p55_p5 = por %p54_p2, %p53_p0  ;;  %p1127_p6 = por %p125_p3, %p53_p0 }
   0xc   : > { %p131_p7 = scmp.eq.s32.totalorder %s872_s21, 1  ;;  %p874_p9 = scmp.ge.s32.totalorder %s1057_s20, 2 }
   0xe   : > { %p1131_p8 = por %p131_p7, %p130_p4  ;;  %156 = sbr.rel (%p874_p9) target bundleno = 31 (0x1f), region = 28 }
  0x13   : > { %159 = sbr.rel (!%p55_p5) target bundleno = 31 (0x1f), region = 32  ;;  %s161_s28 = sand.u32 (%p55_p5), 1, %s1053_s19  }
  0x14   : > { %s876_s29 = sshll.u32 (%p55_p5), %s1057_s20, 3  ;;  %s875_s30 = sshll.u32 (%p55_p5), %s161_s28, 6 }
  0x15   : > { %s165_s7 = scalar_lea.vmem (%p55_p5), %s1316_s1, %s876_s29  ;;  %s163_s8 = scalar_lea.vmem (%p55_p5), [#allocation3], %s875_s30 }
  0x16   : > { %v208_v0 = vld [vmem:[%s165_s7] sm:$0xff] (%p55_p5)  ;;  %v210_v1 = vld [vmem:[%s165_s7 + $0x10] sm:$0xff] (%p55_p5) }
  0x17   : > { %v212_v2 = vld [vmem:[%s165_s7 + $0x20] sm:$0xff] (%p55_p5)  ;;  %209 = vst [vmem:[%s163_s8] sm:$0xff] (%p55_p5), %v208_v0  ;;  %v214_v3 = vld [vmem:[%s165_s7 + $0x30] sm:$0xff] (%p55_p5) }
  0x18   : > { %211 = vst [vmem:[%s163_s8 + $0x8] sm:$0xff] %v210_v1  ;;  %v216_v4 = vld [vmem:[%s165_s7 + $0x40] sm:$0xff]  ;;  %v218_v5 = vld [vmem:[%s165_s7 + $0x50] sm:$0xff] }
  0x19   : > { %213 = vst [vmem:[%s163_s8 + $0x10] sm:$0xff] %v212_v2  ;;  %v220_v6 = vld [vmem:[%s165_s7 + $0x60] sm:$0xff]  ;;  %v222_v7 = vld [vmem:[%s165_s7 + $0x70] sm:$0xff] }
  0x1a   : > { %215 = vst [vmem:[%s163_s8 + $0x18] sm:$0xff] %v214_v3 }
  0x1b   : > { %217 = vst [vmem:[%s163_s8 + $0x20] sm:$0xff] %v216_v4 }
  0x1c   : > { %219 = vst [vmem:[%s163_s8 + $0x28] sm:$0xff] %v218_v5 }
  0x1d   : > { %221 = vst [vmem:[%s163_s8 + $0x30] sm:$0xff] %v220_v6 }
  0x1e   : > { %223 = vst [vmem:[%s163_s8 + $0x38] sm:$0xff] %v222_v7 }
  0x1f PF: > { %p877_p10 = scmp.ge.s32.totalorder %s1057_s20, 1  ;;  %p228_p11 = scmp.lt.s32.totalorder %s1057_s20, 3 }
  0x21   : > { %p229_p12 = pnand %p877_p10, %p228_p11 }
  0x22   : > { %s1151_s11 = sand.u32 (!%p229_p12), 1, %s1049_s18   ;;  %s260_s23 = sld [smem:[#allocation2]] (!%p229_p12) }
  0x23   : > { %232 = sbr.rel (%p229_p12) target bundleno = 646 (0x286), region = 70  ;;  %s878_s12 = sshll.u32 (!%p229_p12), %s1151_s11, 6 }
  0x24   : > { %s1157_s13 = scalar_lea.vmem (!%p229_p12), [#allocation3], %s878_s12  ;;  %s879_s24 = sshll.u32 (!%p229_p12), %s1151_s11, 4 }
  0x25   : > { %s916_s28 = sshll.u32 (!%p229_p12), %s871_s0, 4  ;;  %s259_s6 = scalar_lea.vmem (!%p229_p12), [#allocation4], %s879_s24 }
  0x26   : > { %s800_s5 = scalar_lea.hbm (!%p229_p12), %s1319_s4, %s916_s28  ;;  %s801_s7 = sshll.u32 (!%p229_p12), %s259_s6, 4  ;;  %s802_s7 = int_to_ptr.vmem [resolvable:$true] %s801_s7 }
  0x27   : > { %s803_s8 = sshll.u32 (!%p229_p12), %s800_s5, 4  ;;  %s789_s0 = scalar_lea.sflag (!%p229_p12), [#allocation5], %s1151_s11  ;;  %s804_s8 = int_to_ptr.hbm [resolvable:$true] %s803_s8 }
  0x28   : > { %v1148_v8 = vld [vmem:[%s1318_s3] sm:$0xff]  ;;  %vm265_vm0 = vcmask 64512   ;;  %v883_v10 = vld [vmem:[%s1157_s13 + $0x8] sm:$0xff]  ;;  %v887_v11 = vld [vmem:[%s1157_s13 + $0x10] sm:$0xff]  ;;  %v1203_v24 = vstv %s260_s23  ;;  %vm785_vm1 = vcmask 130048   ;;  %s1009_s9 = sshra.s32 %s804_s8, 4  ;;  %s1010_s9 = int_to_ptr.hbm [resolvable:$true] %s1009_s9 }
  0x29   : > { %284 = vmatpush.msra.mxu0 %v1148_v8  ;;  %341 = vmatpush.msra.mxu2 %v1148_v8  ;;  %v264_v9 = vld [vmem:[%s1157_s13] sm:$0xff]  ;;  %v891_v12 = vld [vmem:[%s1157_s13 + $0x18] sm:$0xff]  ;;  %v1171_v13 = vld [vmem:[%s1317_s2 + $0x8] sm:$0xff]  ;;  %s1011_s10 = scalar_lea.hbm %s1010_s9, 16  ;;  %s1015_s14 = scalar_lea.hbm %s1319_s4, 32 }
  0x2a   : > { %880 = vmatmul.msk.f32.vlgmr.msra.gmra.mxu0 %vm265_vm0, %v264_v9  ;;  %884 = vmatmul.msk.f32.vlgmr.msra.gmra.mxu2 %vm265_vm0, %v883_v10  ;;  %v1176_v14 = vld [vmem:[%s1317_s2] sm:$0xff]  ;;  %v899_v20 = vld [vmem:[%s1157_s13 + $0x28] sm:$0xff]  ;;  %v903_v21 = vld [vmem:[%s1157_s13 + $0x30] sm:$0xff]  ;;  %p1012_p13 = scmp.ne.s32.totalorder %s1010_s9, %s1011_s10  ;;  %p1016_p2 = scmp.lt.s32.totalorder %s1010_s9, %s1319_s4 }
  0x2b   : > { %391 = vmatpush.msrb.mxu0 %v1148_v8  ;;  %v895_v19 = vld [vmem:[%s1157_s13 + $0x20] sm:$0xff]  ;;  %v907_v48 = vld [vmem:[%s1157_s13 + $0x38] sm:$0xff]  ;;  %p1017_p3 = scmp.lt.s32.totalorder %s1015_s14, %s1011_s10 }
  0x2c   : > { %p1013_p0 = pnand %p1012_p13, %p1127_p6 }
  0x2d   : > { %441 = vmatpush.msra.mxu0 %v1148_v8  ;;  %p1018_p4 = por %p1017_p3, %p1016_p2 }
  0x2e   : > { %p1014_p1 = pneg %p1013_p0 }
  0x30   : > { %p1019_p5 = pnand %p1018_p4, %p1014_p1 }
  0x32   : > { %888 = vmatmul.msk.f32.vlgmr.msrb.gmra.mxu0 %vm265_vm0, %v887_v11 }
  0x3a   : > { %892 = vmatmul.msk.f32.vlgmr.msra.gmra.mxu0 %vm265_vm0, %v891_v12 }
  0xa7   : > { %v286_v15 = vpop.f32.mrf.mxu0 }
  0xa8   : > { %310 = vmatpush.msra.mxu1 %v286_v15  ;;  %917 = vmatpush.msra.mxu3 %v286_v15 }
  0xa9   : > { %882 = vmatmul.msk.f32.vlgmr.msra.gmra.mxu3 %vm265_vm0, %v1171_v13  ;;  %881 = vmatmul.msk.f32.vlgmr.msra.gmra.mxu1 %vm265_vm0, %v1176_v14 }
  0xad   : > { %v343_v16 = vpop.f32.mrf.mxu2 }
  0xae   : > { %361 = vmatpush.msrb.mxu3 %v343_v16 }
  0xaf   : > { %v393_v17 = vpop.f32.mrf.mxu0 }
  0xb0   : > { %491 = vmatpush.msra.mxu3 %v1148_v8  ;;  %411 = vmatpush.msrb.mxu2 %v393_v17 }
  0xb1   : > { %885 = vmatmul.msk.f32.vlgmr.msrb.gmra.mxu3 %vm265_vm0, %v1176_v14  ;;  %889 = vmatmul.msk.f32.vlgmr.msrb.gmra.mxu2 %vm265_vm0, %v1176_v14 }
  0xb2   : > { %541 = vmatpush.msra.mxu2 %v1148_v8 }
  0xb7   : > { %v443_v18 = vpop.f32.mrf.mxu0 }
  0xb8   : > { %461 = vmatpush.msrb.mxu1 %v443_v18 }
  0xb9   : > { %886 = vmatmul.msk.f32.gmra.mxu3 %vm265_vm0, %v1171_v13  ;;  %890 = vmatmul.msk.f32.gmra.mxu2 %vm265_vm0, %v1171_v13 }
  0xba   : > { %893 = vmatmul.msk.f32.vlgmr.msrb.gmra.mxu1 %vm265_vm0, %v1176_v14 }
  0xbb   : > { %591 = vmatpush.msra.mxu1 %v1148_v8 }
  0xc1   : > { %896 = vmatmul.msk.f32.vlgmr.msra.gmra.mxu3 %vm265_vm0, %v895_v19  ;;  %900 = vmatmul.msk.f32.vlgmr.msra.gmra.mxu2 %vm265_vm0, %v899_v20 }
  0xc2   : > { %894 = vmatmul.msk.f32.gmra.mxu1 %vm265_vm0, %v1171_v13 }
  0xca   : > { %904 = vmatmul.msk.f32.vlgmr.msra.gmra.mxu1 %vm265_vm0, %v903_v21 }
 0x126   : > { %v312_v23 = vpop.f32.mrf.mxu1 }
 0x127   : > { %v1206_v25 = vmul.f32 %v1203_v24, %v312_v23 }
 0x12c   : > { %v315_v22 = vpop.f32.mrf.mxu3 }
 0x12d   : > { %v1219_v37 = vmul.f32 %v1203_v24, %v315_v22 }
 0x134   : > { %v363_v26 = vpop.f32.mrf.mxu3  ;;  %v413_v27 = vpop.f32.mrf.mxu2 }
 0x135   : > { %v1209_v28 = vmul.f32 %v363_v26, %v1203_v24  ;;  %v1212_v29 = vmul.f32 %v413_v27, %v1203_v24 }
 0x137   : > { %v671_v30 = vmax.f32 %v1206_v25, %v1209_v28  ;;  %v463_v31 = vpop.f32.mrf.mxu1 }
 0x138   : > { %v469_v32 = vmul.f32 %v463_v31, %v1203_v24 }
 0x139   : > { %v673_v33 = vmax.f32 %v671_v30, %v1212_v29 }
 0x13b   : > { %v675_v34 = vmax.f32 %v673_v33, %v469_v32 }
 0x13c   : > { %v366_v35 = vpop.f32.mrf.mxu3  ;;  %v416_v36 = vpop.f32.mrf.mxu2 }
 0x13d   : > { %v1222_v38 = vmul.f32 %v366_v35, %v1203_v24  ;;  %v1225_v39 = vmul.f32 %v416_v36, %v1203_v24 }
 0x13f   : > { %v672_v40 = vmax.f32 %v1219_v37, %v1222_v38  ;;  %v466_v41 = vpop.f32.mrf.mxu1 }
 0x140   : > { %v1230_v42 = vmul.f32 %v466_v41, %v1203_v24 }
 0x141   : > { %v674_v43 = vmax.f32 %v672_v40, %v1225_v39 }
 0x143   : > { %v676_v44 = vmax.f32 %v674_v43, %v1230_v42 }
 0x144   : > { %v493_v45 = vpop.f32.mrf.mxu3  ;;  %v543_v46 = vpop.f32.mrf.mxu2 }
 0x145   : > { %511 = vmatpush.msrb.mxu0 %v493_v45  ;;  %561 = vmatpush.msrb.mxu3 %v543_v46 }
 0x146   : > { %897 = vmatmul.msk.f32.vlgmr.msrb.gmra.mxu0 %vm265_vm0, %v1176_v14  ;;  %901 = vmatmul.msk.f32.vlgmr.msrb.gmra.mxu3 %vm265_vm0, %v1176_v14 }
 0x147   : > { %v593_v47 = vpop.f32.mrf.mxu1  ;;  %641 = vmatpush.msra.mxu0 %v1148_v8 }
 0x148   : > { %611 = vmatpush.msrb.mxu2 %v593_v47 }
 0x149   : > { %905 = vmatmul.msk.f32.vlgmr.msrb.gmra.mxu2 %vm265_vm0, %v1176_v14 }
 0x14e   : > { %898 = vmatmul.msk.f32.gmra.mxu0 %vm265_vm0, %v1171_v13  ;;  %902 = vmatmul.msk.f32.gmra.mxu3 %vm265_vm0, %v1171_v13 }
 0x151   : > { %906 = vmatmul.msk.f32.gmra.mxu2 %vm265_vm0, %v1171_v13 }
 0x156   : > { %908 = vmatmul.msk.f32.vlgmr.msra.gmra.mxu0 %vm265_vm0, %v907_v48 }
 0x1c3   : > { %v513_v49 = vpop.f32.mrf.mxu0 }
 0x1c4   : > { %v519_v50 = vmul.f32 %v513_v49, %v1203_v24 }
 0x1c6   : > { %v677_v51 = vmax.f32 %v675_v34, %v519_v50 }
 0x1c9   : > { %v563_v56 = vpop.f32.mrf.mxu3 }
 0x1ca   : > { %v569_v58 = vmul.f32 %v563_v56, %v1203_v24 }
 0x1cb   : > { %v516_v52 = vpop.f32.mrf.mxu0 }
 0x1cc   : > { %v1251_v53 = vmul.f32 %v516_v52, %v1203_v24  ;;  %v613_v57 = vpop.f32.mrf.mxu2  ;;  %v679_v59 = vmax.f32 %v677_v51, %v569_v58 }
 0x1cd   : > { %v619_v60 = vmul.f32 %v613_v57, %v1203_v24 }
 0x1ce   : > { %v678_v54 = vmax.f32 %v676_v44, %v1251_v53 }
 0x1cf   : > { %v681_v0 = vmax.f32 %v679_v59, %v619_v60 }
 0x1d1   : > { %v566_v61 = vpop.f32.mrf.mxu3 }
 0x1d2   : > { %v1261_v62 = vmul.f32 %v566_v61, %v1203_v24 }
 0x1d3   : > { %v643_v55 = vpop.f32.mrf.mxu0 }
 0x1d4   : > { %661 = vmatpush.msrb.mxu1 %v643_v55  ;;  %v616_v1 = vpop.f32.mrf.mxu2  ;;  %v680_v4 = vmax.f32 %v678_v54, %v1261_v62 }
 0x1d5   : > { %909 = vmatmul.msk.f32.vlgmr.msrb.gmra.mxu1 %vm265_vm0, %v1176_v14  ;;  %v1266_v5 = vmul.f32 %v616_v1, %v1203_v24 }
 0x1d7   : > { %v682_v19 = vmax.f32 %v680_v4, %v1266_v5 }
 0x1dd   : > { %910 = vmatmul.msk.f32.gmra.mxu1 %vm265_vm0, %v1171_v13 }
 0x252   : > { %v663_v63 = vpop.f32.mrf.mxu1 }
 0x253   : > { %v669_v2 = vmul.f32 %v663_v63, %v1203_v24 }
 0x255   : > { %v683_v3 = vmax.f32 %v681_v0, %v669_v2 }
 0x257   : > { %v685_v6 = vsub.f32 %v1206_v25, %v683_v3  ;;  %v697_v7 = vsub.f32 %v1209_v28, %v683_v3  ;;  %v709_v8 = vsub.f32 %v1212_v29, %v683_v3  ;;  %v721_v9 = vsub.f32 %v469_v32, %v683_v3 }
 0x258   : > { %v733_v10 = vsub.f32 %v519_v50, %v683_v3  ;;  %v745_v11 = vsub.f32 %v569_v58, %v683_v3  ;;  %v757_v15 = vsub.f32 %v619_v60, %v683_v3  ;;  %v769_v17 = vsub.f32 %v669_v2, %v683_v3 }
 0x259   : > { %v687_v12 = vmul.f32 1.442695, %v685_v6  ;;  %v699_v13 = vmul.f32 1.442695, %v697_v7  ;;  %v711_v14 = vmul.f32 1.442695, %v709_v8 }
 0x25a   : > { %v723_v16 = vmul.f32 1.442695, %v721_v9  ;;  %v666_v18 = vpop.f32.mrf.mxu1  ;;  %v735_v20 = vmul.f32 1.442695, %v733_v10  ;;  %v747_v22 = vmul.f32 1.442695, %v745_v11 }
 0x25b   : > { %959 = vpow2.f32 %v687_v12  ;;  %v670_v21 = vmul.f32 %v666_v18, %v1203_v24  ;;  %v759_v23 = vmul.f32 1.442695, %v757_v15  ;;  %v771_v26 = vmul.f32 1.442695, %v769_v17 }
 0x25c   : > { %961 = vpow2.f32 %v699_v13 }
 0x25d   : > { %963 = vpow2.f32 %v711_v14  ;;  %v684_v25 = vmax.f32 %v682_v19, %v670_v21 }
 0x25e   : > { %965 = vpow2.f32 %v723_v16 }
 0x25f   : > { %967 = vpow2.f32 %v735_v20  ;;  %v686_v27 = vsub.f32 %v1219_v37, %v684_v25  ;;  %v698_v28 = vsub.f32 %v1222_v38, %v684_v25  ;;  %v710_v29 = vsub.f32 %v1225_v39, %v684_v25 }
 0x260   : > { %969 = vpow2.f32 %v747_v22  ;;  %v722_v30 = vsub.f32 %v1230_v42, %v684_v25  ;;  %v734_v31 = vsub.f32 %v1251_v53, %v684_v25  ;;  %v746_v37 = vsub.f32 %v1261_v62, %v684_v25 }
 0x261   : > { %v960_v24 = vpop.eup %959  ;;  %971 = vpow2.f32 %v759_v23  ;;  %v689_v32 = vmul.f32 1.442695, %v686_v27  ;;  %v701_v33 = vmul.f32 1.442695, %v698_v28  ;;  %v713_v34 = vmul.f32 1.442695, %v710_v29 }
 0x262   : > { %v962_v35 = vpop.eup %961  ;;  %v693_v36 = vmul.f32 1.1667607, %v960_v24  ;;  %973 = vpow2.f32 %v771_v26  ;;  %v725_v40 = vmul.f32 1.442695, %v722_v30  ;;  %v737_v39 = vmul.f32 1.442695, %v734_v31 }
 0x263   : > { %v964_v41 = vpop.eup %963  ;;  %v703_v38 = vadd.f32 %v962_v35, %v960_v24  ;;  %v705_v43 = vmul.f32 1.5559005, %v962_v35  ;;  %975 = vpow2.f32 %v689_v32  ;;  %v758_v42 = vsub.f32 %v1266_v5, %v684_v25 }
 0x264   : > { %v966_v44 = vpop.eup %965  ;;  %977 = vpow2.f32 %v701_v33  ;;  %v717_v48 = vmul.f32 2.0748265, %v964_v41  ;;  %v749_v50 = vmul.f32 1.442695, %v746_v37  ;;  %v770_v51 = vsub.f32 %v670_v21, %v684_v25 }
 0x265   : > { %v968_v45 = vpop.eup %967  ;;  %v707_v46 = vadd.f32 %v705_v43, %v693_v36  ;;  %v715_v47 = vadd.f32 %v964_v41, %v703_v38  ;;  %979 = vpow2.f32 %v713_v34  ;;  %v729_v55 = vmul.f32 2.7668257, %v966_v44 }
 0x266   : > { %v970_v49 = vpop.eup %969  ;;  %981 = vpow2.f32 %v725_v40  ;;  %v761_v57 = vmul.f32 1.442695, %v758_v42  ;;  %v741_v61 = vmul.f32 3.6896214, %v968_v45  ;;  %v773_v1 = vmul.f32 1.442695, %v770_v51 }
 0x267   : > { %v972_v52 = vpop.eup %971  ;;  %v719_v53 = vadd.f32 %v717_v48, %v707_v46  ;;  %v727_v54 = vadd.f32 %v966_v44, %v715_v47  ;;  %983 = vpow2.f32 %v737_v39  ;;  %v753_v63 = vmul.f32 4.9201894, %v970_v49 }
 0x268   : > { %v974_v56 = vpop.eup %973  ;;  %985 = vpow2.f32 %v749_v50  ;;  %v765_v8 = vmul.f32 6.5611777, %v972_v52 }
 0x269   : > { %v976_v58 = vpop.eup %975  ;;  %v731_v59 = vadd.f32 %v729_v55, %v719_v53  ;;  %v739_v60 = vadd.f32 %v968_v45, %v727_v54  ;;  %987 = vpow2.f32 %v761_v57  ;;  %v777_v15 = vmul.f32 8.749471, %v974_v56 }
 0x26a   : > { %v978_v62 = vpop.eup %977  ;;  %v694_v0 = vmul.f32 1.1667607, %v976_v58  ;;  %989 = vpow2.f32 %v773_v1 }
 0x26b   : > { %v980_v2 = vpop.eup %979  ;;  %v743_v3 = vadd.f32 %v741_v61, %v731_v59  ;;  %v751_v4 = vadd.f32 %v970_v49, %v739_v60  ;;  %v704_v5 = vadd.f32 %v978_v62, %v976_v58  ;;  %v706_v6 = vmul.f32 1.5559005, %v978_v62 }
 0x26c   : > { %v982_v7 = vpop.eup %981  ;;  %v718_v9 = vmul.f32 2.0748265, %v980_v2 }
 0x26d   : > { %v984_v10 = vpop.eup %983  ;;  %v755_v11 = vadd.f32 %v753_v63, %v743_v3  ;;  %v763_v12 = vadd.f32 %v972_v52, %v751_v4  ;;  %v708_v13 = vadd.f32 %v706_v6, %v694_v0  ;;  %v716_v14 = vadd.f32 %v980_v2, %v704_v5 }
 0x26e   : > { %v730_v16 = vmul.f32 2.7668257, %v982_v7  ;;  %v986_v21 = vpop.eup %985  ;;  %v742_v22 = vmul.f32 3.6896214, %v984_v10 }
 0x26f   : > { %v767_v17 = vadd.f32 %v765_v8, %v755_v11  ;;  %v775_v18 = vadd.f32 %v974_v56, %v763_v12  ;;  %v720_v19 = vadd.f32 %v718_v9, %v708_v13  ;;  %v728_v20 = vadd.f32 %v982_v7, %v716_v14  ;;  %v988_v27 = vpop.eup %987 }
 0x270   : > { %v754_v30 = vmul.f32 4.9201894, %v986_v21  ;;  %v990_v31 = vpop.eup %989  ;;  %v766_v33 = vmul.f32 6.5611777, %v988_v27 }
 0x271   : > { %v779_v23 = vadd.f32 %v777_v15, %v767_v17  ;;  %991 = vrcp.f32 %v775_v18  ;;  %v732_v25 = vadd.f32 %v730_v16, %v720_v19  ;;  %v740_v26 = vadd.f32 %v984_v10, %v728_v20 }
 0x272   : > { %v778_v40 = vmul.f32 8.749471, %v990_v31 }
 0x273   : > { %v744_v28 = vadd.f32 %v742_v22, %v732_v25  ;;  %v752_v29 = vadd.f32 %v986_v21, %v740_v26 }
 0x275   : > { %v756_v24 = vadd.f32 %v754_v30, %v744_v28  ;;  %v764_v32 = vadd.f32 %v988_v27, %v752_v29 }
 0x277   : > { %v992_v34 = vpop.eup %991  ;;  %v768_v35 = vadd.f32 %v766_v33, %v756_v24  ;;  %v776_v36 = vadd.f32 %v990_v31, %v764_v32 }
 0x278   : > { %v783_v37 = vmul.f32 %v992_v34, %v779_v23 }
 0x279   : > { %v780_v41 = vadd.f32 %v778_v40, %v768_v35  ;;  %993 = vrcp.f32 %v776_v36 }
 0x27a   : > { %786 = vst.msk [vmem:[%s259_s6] sm:$0xff] %vm785_vm1, %v783_v37 }
 0x27f   : > { %v994_v38 = vpop.eup %993 }
 0x280   : > { %v784_v43 = vmul.f32 %v994_v38, %v780_v41 }
 0x282   : > { %787 = vst.msk [vmem:[%s259_s6 + $0x8] sm:$0xff] %vm785_vm1, %v784_v43 }
 0x283   : > { %1022 = shalt.err (!%p1019_p5)
}
 0x284   : > { %s1059_s11 = smov 128   ;;  %s1060_s21 = smov 8  }
 0x285   : > { %918 = dma.vmem_to_hbm [thread:$0]  (%p1127_p6), %s802_s7, 256, %s804_s8, %s789_s0, %s1059_s11, %s1059_s11, %s1060_s21  }
 0x286 PF: > { %s818_s23 = sand.u32 1, %s1045_s17   ;;  %p921_p7 = pnand %p874_p9, %p1131_p8 }
 0x287   : > { %s819_s24 = scalar_lea.sflag [#allocation5], %s818_s23 }
 0x288   : > { %p922_p10 = pneg %p921_p7 }
 0x28a   : > { %1040 = dma.done.wait (%p922_p10), %s819_s24, 256  }
 0x28b   : > { %1042 = vsyncadd (%p922_p10), %s819_s24, 4294967040  ;;  %p15_p11 = scmp.ge.s32.totalorder %s1112_s22, 4   ;;  %s1322_s17 = smov %s1049_s18 }
 0x28c   : > { %s1323_s18 = smov %s1053_s19  ;;  %s1324_s19 = smov %s1125_s25 }
 0x28d   : > { %s1325_s20 = smov %s1112_s22  ;;  %17 = sbr.rel (!%p15_p11) target bundleno = 5 (0x5), region = 121 }
 0x292   :  { %825 = vsyncpa [#allocation5], 1 }
 0x293   :  { %827 = vsyncpa [#allocation5 + $0x1], 1 }

</bundles_post_ra>
